<compile_context>
chip_gen: v6e
topology: v6e:2x2x1
jax: 0.10.0
libtpu: 0.0.40
codegen_flags: <defaults>
</compile_context>

<pallas_src>
import functools

import jax
import jax.numpy as jnp
from jax import lax
from jax.experimental import pallas as pl
from jax.experimental.pallas import tpu as pltpu


# --------------------------- fused Pallas kernel ----------------------------

def _skconv_fused_kernel(xp_ref, w_ref, bias_ref, mask_ref, w1_ref, b1_ref,
                         w2_ref, o_ref, *, M, C_out, H, W, Wp, HLp, NB):
    """Whole SKConv_ab forward for NB images, entirely in VMEM.

    xp_ref   : (NB, C_in, Lp)    bf16 zero-padded inputs, spatial flattened
                                 row-major over the padded (>=H+2, W+2) grid
    w_ref    : (M*C_out, 9*C_in) bf16 block-diagonal grouped-conv weight for
                                 all branches, BN scale folded in (tap-major K)
    bias_ref : (M*C_out, 1)      folded BN bias per (branch, channel)
    mask_ref : (1, HLp)          1.0 on valid spatial columns, 0.0 on junk lanes
    w1_ref   : (d, C_out)        fc1 weight with BN scale folded in
    b1_ref   : (d, 1)            fc1 folded BN bias
    w2_ref   : (M*C_out, d)      fc2 weight
    o_ref    : (NB, C_out, HLp)  fused output V, lane-dense padded layout
    """
    # ---- stacked-branch grouped 3x3 conv as ONE GEMM over all NB images -----
    # im2col slab built in VMEM from 9 shifted lane-slices per image; the
    # images are laid side by side along lanes (N = NB * HLp, 128-aligned).
    per_image_cols = []
    for nb in range(NB):
        x_nb = xp_ref[nb]                                  # (C_in, Lp) bf16
        slabs = []
        for kh in range(3):
            for kw in range(3):
                off = kh * Wp + kw                         # static tap offset
                slabs.append(x_nb[:, off:off + HLp])       # (C_in, HLp) bf16
        per_image_cols.append(jnp.concatenate(slabs, axis=0))   # (9*C_in, HLp)
    if NB == 1:
        xcol = per_image_cols[0]
    else:
        xcol = jnp.concatenate(per_image_cols, axis=1)     # (9*C_in, NB*HLp)

    acc = jnp.dot(w_ref[...], xcol,
                  preferred_element_type=jnp.float32)      # (M*C_out, NB*HLp)
    feas = jnp.maximum(acc + bias_ref[...], 0.0)           # folded BN + ReLU

    mask = mask_ref[...]                                   # (1, HLp)
    inv_hw = 1.0 / float(H * W)

    for nb in range(NB):
        f = feas[:, nb * HLp:(nb + 1) * HLp]               # (M*C_out, HLp)

        # ---- GAP of U = sum_m feas_m over the valid spatial columns ---------
        row_sum = jnp.sum(f * mask, axis=1, keepdims=True)  # (M*C_out, 1)
        s = row_sum[0:C_out, :]
        for m in range(1, M):
            s = s + row_sum[m * C_out:(m + 1) * C_out, :]
        s = s * inv_hw                                      # (C_out, 1)

        # ---- fc1 (1x1 conv + folded BN + ReLU) -> fc2 -> branch softmax ------
        z = jnp.maximum(
            jnp.dot(w1_ref[...], s, preferred_element_type=jnp.float32)
            + b1_ref[...], 0.0)                             # (d, 1)
        logits = jnp.dot(w2_ref[...], z,
                         preferred_element_type=jnp.float32)  # (M*C_out, 1)
        chunks = [logits[m * C_out:(m + 1) * C_out, :] for m in range(M)]
        mx = chunks[0]
        for c in chunks[1:]:
            mx = jnp.maximum(mx, c)
        exps = [jnp.exp(c - mx) for c in chunks]
        den = exps[0]
        for e in exps[1:]:
            den = den + e
        inv = 1.0 / den                                     # (C_out, 1)

        # ---- attention-weighted fusion, accumulated per branch ---------------
        v = f[0:C_out, :] * (exps[0] * inv)
        for m in range(1, M):
            v = v + f[m * C_out:(m + 1) * C_out, :] * (exps[m] * inv)
        o_ref[nb] = v


# --------------------------- wrapper (glue + pallas_call) -------------------

def _default_images_per_step(B):
    # v7x has 2 TensorCores/chip -> keep grid=(B,) "parallel" to feed both;
    # single-TC v5e/v6e -> fold the whole batch into one grid step (GEMM N).
    try:
        kind = jax.devices()[0].device_kind.lower()
    except Exception:
        kind = ""
    two_tensorcores = "7" in kind
    return 1 if (two_tensorcores and B > 1) else B


def skconv_ab_forward(x, params, *, M, G, images_per_step=None):
    B, C_in, H, W = x.shape
    C_out = params["bias_col"].shape[0] // M
    d = params["w1f"].shape[0]
    assert C_in % G == 0 and C_out % G == 0, "grouped conv requires G | C_in, C_out"

    if images_per_step is None:
        images_per_step = _default_images_per_step(B)
    NB = images_per_step
    assert B % NB == 0

    Wp = W + 2                           # padded width (conv padding = 1)
    HL = H * Wp                          # valid flattened length
    HLp = ((HL + 127) // 128) * 128      # lane-dense GEMM N / output width
    max_off = 2 * Wp + 2                 # largest static tap offset
    rows_total = -(-(max_off + HLp) // Wp)   # padded rows so all tap windows fit
    pad_bottom = rows_total - H - 1
    Lp = rows_total * Wp

    # Single layout-only pass: cast to bf16 once, one jnp.pad, flatten spatial.
    xp = jnp.pad(x.astype(jnp.bfloat16),
                 ((0, 0), (0, 0), (1, pad_bottom), (1, 1)))
    xp = xp.reshape(B, C_in, Lp)

    # mask of valid spatial columns (width-pad lanes + 128-pad tail are junk)
    cols = jnp.arange(HLp)
    mask = (((cols % Wp) < W) & (cols < HL)).astype(jnp.float32).reshape(1, HLp)

    kernel = functools.partial(_skconv_fused_kernel, M=M, C_out=C_out,
                               H=H, W=W, Wp=Wp, HLp=HLp, NB=NB)

    out = pl.pallas_call(
        kernel,
        grid=(B // NB,),
        in_specs=[
            pl.BlockSpec((NB, C_in, Lp), lambda b: (b, 0, 0)),
            pl.BlockSpec((M * C_out, 9 * C_in), lambda b: (0, 0)),
            pl.BlockSpec((M * C_out, 1), lambda b: (0, 0)),
            pl.BlockSpec((1, HLp), lambda b: (0, 0)),
            pl.BlockSpec((d, C_out), lambda b: (0, 0)),
            pl.BlockSpec((d, 1), lambda b: (0, 0)),
            pl.BlockSpec((M * C_out, d), lambda b: (0, 0)),
        ],
        out_specs=pl.BlockSpec((NB, C_out, HLp), lambda b: (b, 0, 0)),
        out_shape=jax.ShapeDtypeStruct((B, C_out, HLp), jnp.float32),
        compiler_params=pltpu.CompilerParams(
            dimension_semantics=("parallel",)),
    )(xp, params["w9_bf16"], params["bias_col"], mask,
      params["w1f"], params["b1_col"], params["w2"])

    # drop the junk lanes (>= H*Wp tail and the 2 width-pad columns per row)
    return out[:, :, :HL].reshape(B, C_out, H, Wp)[:, :, :, :W]


# --------------------------- deterministic parameter init -------------------

def init_params(key, *, in_channels, out_channels, M, G, r=16, L=32):
    assert in_channels % G == 0 and out_channels % G == 0
    d = max(int(in_channels / r), L)
    cin_g = in_channels // G
    cout_g = out_channels // G
    ks = jax.random.split(key, 11)
    eps = 1e-5

    # grouped 3x3 conv weights, one per branch: (M, C_out, C_in//G, 3, 3)
    w_conv = 0.1 * jax.random.normal(ks[0], (M, out_channels, cin_g, 3, 3), jnp.float32)
    # BatchNorm2d(out_channels) per branch (folded inference form)
    gamma = 1.0 + 0.1 * jax.random.normal(ks[1], (M, out_channels), jnp.float32)
    beta = 0.1 * jax.random.normal(ks[2], (M, out_channels), jnp.float32)
    r_mean = 0.05 * jax.random.normal(ks[3], (M, out_channels), jnp.float32)
    r_var = 1.0 + 0.1 * jax.random.uniform(ks[4], (M, out_channels), jnp.float32)
    scale_bn = gamma / jnp.sqrt(r_var + eps)
    bias_bn = beta - r_mean * scale_bn

    # dense block-diagonal grouped weight, tap-major K (K = tap*C_in + ci),
    # branches stacked along rows, BN scale folded in, cast to bf16 for the MXU
    w_taps = w_conv.transpose(0, 3, 4, 1, 2).reshape(M, 9, out_channels, cin_g)
    rows = jnp.arange(out_channels)
    cols = (rows // cout_g)[:, None] * cin_g + jnp.arange(cin_g)[None, :]
    dense = jnp.zeros((M, 9, out_channels, in_channels), jnp.float32)
    dense = dense.at[:, :, rows[:, None], cols].set(w_taps)
    w9 = dense.transpose(0, 2, 1, 3).reshape(M * out_channels, 9 * in_channels)
    w9_bf16 = (scale_bn.reshape(M * out_channels, 1) * w9).astype(jnp.bfloat16)
    bias_col = bias_bn.reshape(M * out_channels, 1)

    # fc1: Conv2d(out_channels, d, 1, bias=False) + BN(d) + ReLU (scale folded)
    w1 = 0.1 * jax.random.normal(ks[5], (d, out_channels), jnp.float32)
    gamma1 = 1.0 + 0.1 * jax.random.normal(ks[6], (d,), jnp.float32)
    beta1 = 0.1 * jax.random.normal(ks[7], (d,), jnp.float32)
    mean1 = 0.05 * jax.random.normal(ks[8], (d,), jnp.float32)
    var1 = 1.0 + 0.1 * jax.random.uniform(ks[9], (d,), jnp.float32)
    scale1 = gamma1 / jnp.sqrt(var1 + eps)
    bias1 = beta1 - mean1 * scale1
    w1f = scale1[:, None] * w1
    b1_col = bias1[:, None]

    # fc2: Conv2d(d, out_channels * M, 1, 1, bias=False)
    w2 = 0.1 * jax.random.normal(ks[10], (out_channels * M, d), jnp.float32)

    return dict(
        # kernel-side parameters
        w9_bf16=w9_bf16, bias_col=bias_col, w1f=w1f, b1_col=b1_col, w2=w2,
        # reference-side parameters
        w_conv=w_conv, scale_bn=scale_bn, bias_bn=bias_bn,
        w1=w1, scale1=scale1, bias1=bias1,
    ), d


# --------------------------- plain-JAX reference (for verification) ---------

def reference_forward(x, params, *, M, G):
    """Faithful SKConv_ab forward; conv operands bf16-rounded like the kernel."""
    B, C_in, H, W = x.shape
    C_out = params["scale_bn"].shape[1]
    hp = lax.Precision.HIGHEST
    x_bf = x.astype(jnp.bfloat16)
    feas_list = []
    for m in range(M):
        w_m = (params["w_conv"][m]
               * params["scale_bn"][m][:, None, None, None]).astype(jnp.bfloat16)
        y = lax.conv_general_dilated(
            x_bf, w_m, (1, 1), ((1, 1), (1, 1)),
            dimension_numbers=("NCHW", "OIHW", "NCHW"),
            feature_group_count=G, precision=hp,
            preferred_element_type=jnp.float32)
        y = y + params["bias_bn"][m][None, :, None, None]
        feas_list.append(jnp.maximum(y, 0.0))
    U = feas_list[0]
    for f in feas_list[1:]:
        U = U + f
    s = jnp.mean(U, axis=(2, 3))                                   # (B, C_out)
    z = jnp.maximum(jnp.dot(s, params["w1"].T, precision=hp)
                    * params["scale1"][None, :] + params["bias1"][None, :], 0.0)
    logits = jnp.dot(z, params["w2"].T, precision=hp)
    a = jax.nn.softmax(logits.reshape(B, M, C_out), axis=1)
    V = feas_list[0] * a[:, 0, :, None, None]
    for m in range(1, M):
        V = V + feas_list[m] * a[:, m, :, None, None]
    return V


# --------------------------- main -------------------------------------------

if __name__ == "__main__":
    B, C_in, C_out, H, W = 2, 32, 32, 16, 16
    M, G = 2, 4   # 2 branches, 4 conv groups (valid SKConv_ab construction)

    key = jax.random.PRNGKey(0)
    kx, kp = jax.random.split(key)
    x = jax.random.normal(kx, (B, C_in, H, W), jnp.float32)
    params, d = init_params(kp, in_channels=C_in, out_channels=C_out, M=M, G=G)

    V = skconv_ab_forward(x, params, M=M, G=G)
    V = jax.block_until_ready(V)

    V_ref = reference_forward(x, params, M=M, G=G)
    assert V.shape == (B, C_out, H, W)
    err = float(jnp.max(jnp.abs(V - V_ref)))
    assert err < 5e-3, f"mismatch vs reference: max abs err = {err}"
    print("KERNEL_OK")
</pallas_src>

<mosaic_0001>
module attributes {stable_mosaic.version = 11 : i64} {
  func.func @_skconv_fused_kernel(%arg0: i32, %arg1: memref<2x32x432xbf16, #tpu.memory_space<vmem>>, %arg2: memref<64x288xbf16, #tpu.memory_space<vmem>>, %arg3: memref<64x1xf32, #tpu.memory_space<vmem>>, %arg4: memref<1x384xf32, #tpu.memory_space<vmem>>, %arg5: memref<32x32xf32, #tpu.memory_space<vmem>>, %arg6: memref<32x1xf32, #tpu.memory_space<vmem>>, %arg7: memref<64x32xf32, #tpu.memory_space<vmem>>, %arg8: memref<2x32x384xf32, #tpu.memory_space<vmem>>) attributes {dimension_semantics = [#tpu.dimension_semantics<parallel>], iteration_bounds = array<i64: 1>, scalar_prefetch = 0 : i64, scratch_operands = 0 : i64, tpu.core_type = #tpu.core_type<tc>, window_params = [{transform_indices = @transform_0, window_bounds = array<i64: 2, 32, 432>}, {pipeline_mode = #tpu.pipeline_mode<synchronous>, transform_indices = @transform_1, window_bounds = array<i64: 64, 288>}, {pipeline_mode = #tpu.pipeline_mode<synchronous>, transform_indices = @transform_2, window_bounds = array<i64: 64, 1>}, {pipeline_mode = #tpu.pipeline_mode<synchronous>, transform_indices = @transform_3, window_bounds = array<i64: 1, 384>}, {pipeline_mode = #tpu.pipeline_mode<synchronous>, transform_indices = @transform_4, window_bounds = array<i64: 32, 32>}, {pipeline_mode = #tpu.pipeline_mode<synchronous>, transform_indices = @transform_5, window_bounds = array<i64: 32, 1>}, {pipeline_mode = #tpu.pipeline_mode<synchronous>, transform_indices = @transform_6, window_bounds = array<i64: 64, 32>}, {transform_indices = @transform_7, window_bounds = array<i64: 2, 32, 384>}]} {
    %c0 = arith.constant 0 : index
    %c0_0 = arith.constant 0 : index
    %c0_1 = arith.constant 0 : index
    %0 = vector.load %arg1[%c0, %c0_0, %c0_1] : memref<2x32x432xbf16, #tpu.memory_space<vmem>>, vector<1x32x432xbf16>
    %1 = vector.shape_cast %0 : vector<1x32x432xbf16> to vector<32x432xbf16>
    %2 = vector.extract_strided_slice %1 {offsets = [0, 0], sizes = [32, 384], strides = [1, 1]} : vector<32x432xbf16> to vector<32x384xbf16>
    %3 = vector.extract_strided_slice %1 {offsets = [0, 1], sizes = [32, 384], strides = [1, 1]} : vector<32x432xbf16> to vector<32x384xbf16>
    %4 = vector.extract_strided_slice %1 {offsets = [0, 2], sizes = [32, 384], strides = [1, 1]} : vector<32x432xbf16> to vector<32x384xbf16>
    %5 = vector.extract_strided_slice %1 {offsets = [0, 18], sizes = [32, 384], strides = [1, 1]} : vector<32x432xbf16> to vector<32x384xbf16>
    %6 = vector.extract_strided_slice %1 {offsets = [0, 19], sizes = [32, 384], strides = [1, 1]} : vector<32x432xbf16> to vector<32x384xbf16>
    %7 = vector.extract_strided_slice %1 {offsets = [0, 20], sizes = [32, 384], strides = [1, 1]} : vector<32x432xbf16> to vector<32x384xbf16>
    %8 = vector.extract_strided_slice %1 {offsets = [0, 36], sizes = [32, 384], strides = [1, 1]} : vector<32x432xbf16> to vector<32x384xbf16>
    %9 = vector.extract_strided_slice %1 {offsets = [0, 37], sizes = [32, 384], strides = [1, 1]} : vector<32x432xbf16> to vector<32x384xbf16>
    %10 = vector.extract_strided_slice %1 {offsets = [0, 38], sizes = [32, 384], strides = [1, 1]} : vector<32x432xbf16> to vector<32x384xbf16>
    %11 = tpu.concatenate %2, %3, %4, %5, %6, %7, %8, %9, %10 in 0 : vector<32x384xbf16>, vector<32x384xbf16>, vector<32x384xbf16>, vector<32x384xbf16>, vector<32x384xbf16>, vector<32x384xbf16>, vector<32x384xbf16>, vector<32x384xbf16>, vector<32x384xbf16> -> vector<288x384xbf16>
    %c1 = arith.constant 1 : index
    %c0_2 = arith.constant 0 : index
    %c0_3 = arith.constant 0 : index
    %12 = vector.load %arg1[%c1, %c0_2, %c0_3] : memref<2x32x432xbf16, #tpu.memory_space<vmem>>, vector<1x32x432xbf16>
    %13 = vector.shape_cast %12 : vector<1x32x432xbf16> to vector<32x432xbf16>
    %14 = vector.extract_strided_slice %13 {offsets = [0, 0], sizes = [32, 384], strides = [1, 1]} : vector<32x432xbf16> to vector<32x384xbf16>
    %15 = vector.extract_strided_slice %13 {offsets = [0, 1], sizes = [32, 384], strides = [1, 1]} : vector<32x432xbf16> to vector<32x384xbf16>
    %16 = vector.extract_strided_slice %13 {offsets = [0, 2], sizes = [32, 384], strides = [1, 1]} : vector<32x432xbf16> to vector<32x384xbf16>
    %17 = vector.extract_strided_slice %13 {offsets = [0, 18], sizes = [32, 384], strides = [1, 1]} : vector<32x432xbf16> to vector<32x384xbf16>
    %18 = vector.extract_strided_slice %13 {offsets = [0, 19], sizes = [32, 384], strides = [1, 1]} : vector<32x432xbf16> to vector<32x384xbf16>
    %19 = vector.extract_strided_slice %13 {offsets = [0, 20], sizes = [32, 384], strides = [1, 1]} : vector<32x432xbf16> to vector<32x384xbf16>
    %20 = vector.extract_strided_slice %13 {offsets = [0, 36], sizes = [32, 384], strides = [1, 1]} : vector<32x432xbf16> to vector<32x384xbf16>
    %21 = vector.extract_strided_slice %13 {offsets = [0, 37], sizes = [32, 384], strides = [1, 1]} : vector<32x432xbf16> to vector<32x384xbf16>
    %22 = vector.extract_strided_slice %13 {offsets = [0, 38], sizes = [32, 384], strides = [1, 1]} : vector<32x432xbf16> to vector<32x384xbf16>
    %23 = tpu.concatenate %14, %15, %16, %17, %18, %19, %20, %21, %22 in 0 : vector<32x384xbf16>, vector<32x384xbf16>, vector<32x384xbf16>, vector<32x384xbf16>, vector<32x384xbf16>, vector<32x384xbf16>, vector<32x384xbf16>, vector<32x384xbf16>, vector<32x384xbf16> -> vector<288x384xbf16>
    %24 = tpu.concatenate %11, %23 in 1 : vector<288x384xbf16>, vector<288x384xbf16> -> vector<288x768xbf16>
    %c0_4 = arith.constant 0 : index
    %c0_5 = arith.constant 0 : index
    %25 = vector.load %arg2[%c0_4, %c0_5] : memref<64x288xbf16, #tpu.memory_space<vmem>>, vector<64x288xbf16>
    %cst = arith.constant dense<0.000000e+00> : vector<64x768xf32>
    %26 = tpu.matmul %25, %24, %cst {dimension_numbers = #tpu.dot_dimension_numbers<[1], [0], [0], [1], [0, 0, 1, 1], [], []>} : vector<64x288xbf16>, vector<288x768xbf16>, vector<64x768xf32> -> vector<64x768xf32>
    %c0_6 = arith.constant 0 : index
    %c0_7 = arith.constant 0 : index
    %27 = vector.load %arg3[%c0_6, %c0_7] : memref<64x1xf32, #tpu.memory_space<vmem>>, vector<64x1xf32>
    %28 = vector.broadcast %27 : vector<64x1xf32> to vector<64x768xf32>
    %29 = arith.addf %26, %28 : vector<64x768xf32>
    %cst_8 = arith.constant 0.000000e+00 : f32
    %30 = vector.broadcast %cst_8 : f32 to vector<64x768xf32>
    %31 = arith.maximumf %29, %30 : vector<64x768xf32>
    %c0_9 = arith.constant 0 : index
    %c0_10 = arith.constant 0 : index
    %32 = vector.load %arg4[%c0_9, %c0_10] : memref<1x384xf32, #tpu.memory_space<vmem>>, vector<1x384xf32>
    %33 = vector.extract_strided_slice %31 {offsets = [0, 0], sizes = [64, 384], strides = [1, 1]} : vector<64x768xf32> to vector<64x384xf32>
    %34 = vector.broadcast %32 : vector<1x384xf32> to vector<64x384xf32>
    %35 = arith.mulf %33, %34 : vector<64x384xf32>
    %cst_11 = arith.constant dense<0.000000e+00> : vector<64xf32>
    %36 = vector.multi_reduction <add>, %35, %cst_11 [1] : vector<64x384xf32> to vector<64xf32>
    %37 = vector.shape_cast %36 : vector<64xf32> to vector<64x1xf32>
    %38 = vector.extract_strided_slice %37 {offsets = [0, 0], sizes = [32, 1], strides = [1, 1]} : vector<64x1xf32> to vector<32x1xf32>
    %39 = vector.extract_strided_slice %37 {offsets = [32, 0], sizes = [32, 1], strides = [1, 1]} : vector<64x1xf32> to vector<32x1xf32>
    %40 = arith.addf %38, %39 : vector<32x1xf32>
    %cst_12 = arith.constant 3.906250e-03 : f32
    %41 = vector.broadcast %cst_12 : f32 to vector<32x1xf32>
    %42 = arith.mulf %40, %41 : vector<32x1xf32>
    %c0_13 = arith.constant 0 : index
    %c0_14 = arith.constant 0 : index
    %43 = vector.load %arg5[%c0_13, %c0_14] : memref<32x32xf32, #tpu.memory_space<vmem>>, vector<32x32xf32>
    %cst_15 = arith.constant dense<0.000000e+00> : vector<32x1xf32>
    %44 = tpu.matmul %43, %42, %cst_15 {dimension_numbers = #tpu.dot_dimension_numbers<[1], [0], [0], [1], [0, 0, 1, 1], [], []>} : vector<32x32xf32>, vector<32x1xf32>, vector<32x1xf32> -> vector<32x1xf32>
    %c0_16 = arith.constant 0 : index
    %c0_17 = arith.constant 0 : index
    %45 = vector.load %arg6[%c0_16, %c0_17] : memref<32x1xf32, #tpu.memory_space<vmem>>, vector<32x1xf32>
    %46 = arith.addf %44, %45 : vector<32x1xf32>
    %cst_18 = arith.constant 0.000000e+00 : f32
    %47 = vector.broadcast %cst_18 : f32 to vector<32x1xf32>
    %48 = arith.maximumf %46, %47 : vector<32x1xf32>
    %c0_19 = arith.constant 0 : index
    %c0_20 = arith.constant 0 : index
    %49 = vector.load %arg7[%c0_19, %c0_20] : memref<64x32xf32, #tpu.memory_space<vmem>>, vector<64x32xf32>
    %cst_21 = arith.constant dense<0.000000e+00> : vector<64x1xf32>
    %50 = tpu.matmul %49, %48, %cst_21 {dimension_numbers = #tpu.dot_dimension_numbers<[1], [0], [0], [1], [0, 0, 1, 1], [], []>} : vector<64x32xf32>, vector<32x1xf32>, vector<64x1xf32> -> vector<64x1xf32>
    %51 = vector.extract_strided_slice %50 {offsets = [0, 0], sizes = [32, 1], strides = [1, 1]} : vector<64x1xf32> to vector<32x1xf32>
    %52 = vector.extract_strided_slice %50 {offsets = [32, 0], sizes = [32, 1], strides = [1, 1]} : vector<64x1xf32> to vector<32x1xf32>
    %53 = arith.maximumf %51, %52 : vector<32x1xf32>
    %54 = arith.subf %51, %53 : vector<32x1xf32>
    %55 = math.exp %54 : vector<32x1xf32>
    %56 = arith.subf %52, %53 : vector<32x1xf32>
    %57 = math.exp %56 : vector<32x1xf32>
    %58 = arith.addf %55, %57 : vector<32x1xf32>
    %cst_22 = arith.constant 1.000000e+00 : f32
    %59 = vector.broadcast %cst_22 : f32 to vector<32x1xf32>
    %60 = arith.divf %59, %58 : vector<32x1xf32>
    %61 = vector.extract_strided_slice %33 {offsets = [0, 0], sizes = [32, 384], strides = [1, 1]} : vector<64x384xf32> to vector<32x384xf32>
    %62 = arith.mulf %55, %60 : vector<32x1xf32>
    %63 = vector.broadcast %62 : vector<32x1xf32> to vector<32x384xf32>
    %64 = arith.mulf %61, %63 : vector<32x384xf32>
    %65 = vector.extract_strided_slice %33 {offsets = [32, 0], sizes = [32, 384], strides = [1, 1]} : vector<64x384xf32> to vector<32x384xf32>
    %66 = arith.mulf %57, %60 : vector<32x1xf32>
    %67 = vector.broadcast %66 : vector<32x1xf32> to vector<32x384xf32>
    %68 = arith.mulf %65, %67 : vector<32x384xf32>
    %69 = arith.addf %64, %68 : vector<32x384xf32>
    %c0_23 = arith.constant 0 : index
    %c0_24 = arith.constant 0 : index
    %c0_25 = arith.constant 0 : index
    %70 = vector.load %arg8[%c0_23, %c0_24, %c0_25] : memref<2x32x384xf32, #tpu.memory_space<vmem>>, vector<1x32x384xf32>
    %71 = vector.shape_cast %70 : vector<1x32x384xf32> to vector<32x384xf32>
    %72 = vector.shape_cast %69 : vector<32x384xf32> to vector<1x32x384xf32>
    tpu.vector_store %arg8[%c0_23, %c0_24, %c0_25], %72 {strides = array<i32>} : memref<2x32x384xf32, #tpu.memory_space<vmem>>, vector<1x32x384xf32>,
    %73 = vector.extract_strided_slice %31 {offsets = [0, 384], sizes = [64, 384], strides = [1, 1]} : vector<64x768xf32> to vector<64x384xf32>
    %74 = vector.broadcast %32 : vector<1x384xf32> to vector<64x384xf32>
    %75 = arith.mulf %73, %74 : vector<64x384xf32>
    %cst_26 = arith.constant dense<0.000000e+00> : vector<64xf32>
    %76 = vector.multi_reduction <add>, %75, %cst_26 [1] : vector<64x384xf32> to vector<64xf32>
    %77 = vector.shape_cast %76 : vector<64xf32> to vector<64x1xf32>
    %78 = vector.extract_strided_slice %77 {offsets = [0, 0], sizes = [32, 1], strides = [1, 1]} : vector<64x1xf32> to vector<32x1xf32>
    %79 = vector.extract_strided_slice %77 {offsets = [32, 0], sizes = [32, 1], strides = [1, 1]} : vector<64x1xf32> to vector<32x1xf32>
    %80 = arith.addf %78, %79 : vector<32x1xf32>
    %cst_27 = arith.constant 3.906250e-03 : f32
    %81 = vector.broadcast %cst_27 : f32 to vector<32x1xf32>
    %82 = arith.mulf %80, %81 : vector<32x1xf32>
    %c0_28 = arith.constant 0 : index
    %c0_29 = arith.constant 0 : index
    %83 = vector.load %arg5[%c0_28, %c0_29] : memref<32x32xf32, #tpu.memory_space<vmem>>, vector<32x32xf32>
    %cst_30 = arith.constant dense<0.000000e+00> : vector<32x1xf32>
    %84 = tpu.matmul %83, %82, %cst_30 {dimension_numbers = #tpu.dot_dimension_numbers<[1], [0], [0], [1], [0, 0, 1, 1], [], []>} : vector<32x32xf32>, vector<32x1xf32>, vector<32x1xf32> -> vector<32x1xf32>
    %c0_31 = arith.constant 0 : index
    %c0_32 = arith.constant 0 : index
    %85 = vector.load %arg6[%c0_31, %c0_32] : memref<32x1xf32, #tpu.memory_space<vmem>>, vector<32x1xf32>
    %86 = arith.addf %84, %85 : vector<32x1xf32>
    %cst_33 = arith.constant 0.000000e+00 : f32
    %87 = vector.broadcast %cst_33 : f32 to vector<32x1xf32>
    %88 = arith.maximumf %86, %87 : vector<32x1xf32>
    %c0_34 = arith.constant 0 : index
    %c0_35 = arith.constant 0 : index
    %89 = vector.load %arg7[%c0_34, %c0_35] : memref<64x32xf32, #tpu.memory_space<vmem>>, vector<64x32xf32>
    %cst_36 = arith.constant dense<0.000000e+00> : vector<64x1xf32>
    %90 = tpu.matmul %89, %88, %cst_36 {dimension_numbers = #tpu.dot_dimension_numbers<[1], [0], [0], [1], [0, 0, 1, 1], [], []>} : vector<64x32xf32>, vector<32x1xf32>, vector<64x1xf32> -> vector<64x1xf32>
    %91 = vector.extract_strided_slice %90 {offsets = [0, 0], sizes = [32, 1], strides = [1, 1]} : vector<64x1xf32> to vector<32x1xf32>
    %92 = vector.extract_strided_slice %90 {offsets = [32, 0], sizes = [32, 1], strides = [1, 1]} : vector<64x1xf32> to vector<32x1xf32>
    %93 = arith.maximumf %91, %92 : vector<32x1xf32>
    %94 = arith.subf %91, %93 : vector<32x1xf32>
    %95 = math.exp %94 : vector<32x1xf32>
    %96 = arith.subf %92, %93 : vector<32x1xf32>
    %97 = math.exp %96 : vector<32x1xf32>
    %98 = arith.addf %95, %97 : vector<32x1xf32>
    %cst_37 = arith.constant 1.000000e+00 : f32
    %99 = vector.broadcast %cst_37 : f32 to vector<32x1xf32>
    %100 = arith.divf %99, %98 : vector<32x1xf32>
    %101 = vector.extract_strided_slice %73 {offsets = [0, 0], sizes = [32, 384], strides = [1, 1]} : vector<64x384xf32> to vector<32x384xf32>
    %102 = arith.mulf %95, %100 : vector<32x1xf32>
    %103 = vector.broadcast %102 : vector<32x1xf32> to vector<32x384xf32>
    %104 = arith.mulf %101, %103 : vector<32x384xf32>
    %105 = vector.extract_strided_slice %73 {offsets = [32, 0], sizes = [32, 384], strides = [1, 1]} : vector<64x384xf32> to vector<32x384xf32>
    %106 = arith.mulf %97, %100 : vector<32x1xf32>
    %107 = vector.broadcast %106 : vector<32x1xf32> to vector<32x384xf32>
    %108 = arith.mulf %105, %107 : vector<32x384xf32>
    %109 = arith.addf %104, %108 : vector<32x384xf32>
    %c1_38 = arith.constant 1 : index
    %c0_39 = arith.constant 0 : index
    %c0_40 = arith.constant 0 : index
    %110 = vector.load %arg8[%c1_38, %c0_39, %c0_40] : memref<2x32x384xf32, #tpu.memory_space<vmem>>, vector<1x32x384xf32>
    %111 = vector.shape_cast %110 : vector<1x32x384xf32> to vector<32x384xf32>
    %112 = vector.shape_cast %109 : vector<32x384xf32> to vector<1x32x384xf32>
    tpu.vector_store %arg8[%c1_38, %c0_39, %c0_40], %112 {strides = array<i32>} : memref<2x32x384xf32, #tpu.memory_space<vmem>>, vector<1x32x384xf32>,
    return
  }
  func.func @transform_0(%arg0: i32) -> (i32, i32, i32) {
    %c0_i32 = arith.constant 0 : i32
    %c0_i32_0 = arith.constant 0 : i32
    %c0_i32_1 = arith.constant 0 : i32
    return %arg0, %c0_i32, %c0_i32_0 : i32, i32, i32
  }
  func.func @transform_1(%arg0: i32) -> (i32, i32) {
    %c0_i32 = arith.constant 0 : i32
    %c0_i32_0 = arith.constant 0 : i32
    %c0_i32_1 = arith.constant 0 : i32
    return %c0_i32, %c0_i32_0 : i32, i32
  }
  func.func @transform_2(%arg0: i32) -> (i32, i32) {
    %c0_i32 = arith.constant 0 : i32
    %c0_i32_0 = arith.constant 0 : i32
    %c0_i32_1 = arith.constant 0 : i32
    return %c0_i32, %c0_i32_0 : i32, i32
  }
  func.func @transform_3(%arg0: i32) -> (i32, i32) {
    %c0_i32 = arith.constant 0 : i32
    %c0_i32_0 = arith.constant 0 : i32
    %c0_i32_1 = arith.constant 0 : i32
    return %c0_i32, %c0_i32_0 : i32, i32
  }
  func.func @transform_4(%arg0: i32) -> (i32, i32) {
    %c0_i32 = arith.constant 0 : i32
    %c0_i32_0 = arith.constant 0 : i32
    %c0_i32_1 = arith.constant 0 : i32
    return %c0_i32, %c0_i32_0 : i32, i32
  }
  func.func @transform_5(%arg0: i32) -> (i32, i32) {
    %c0_i32 = arith.constant 0 : i32
    %c0_i32_0 = arith.constant 0 : i32
    %c0_i32_1 = arith.constant 0 : i32
    return %c0_i32, %c0_i32_0 : i32, i32
  }
  func.func @transform_6(%arg0: i32) -> (i32, i32) {
    %c0_i32 = arith.constant 0 : i32
    %c0_i32_0 = arith.constant 0 : i32
    %c0_i32_1 = arith.constant 0 : i32
    return %c0_i32, %c0_i32_0 : i32, i32
  }
  func.func @transform_7(%arg0: i32) -> (i32, i32, i32) {
    %c0_i32 = arith.constant 0 : i32
    %c0_i32_0 = arith.constant 0 : i32
    %c0_i32_1 = arith.constant 0 : i32
    return %arg0, %c0_i32, %c0_i32_0 : i32, i32, i32
  }
}

</mosaic_0001>

<bundles_post_ra>
// kernel: tpu_custom_call.1
= control target key start
LH: loop header
LB: loop body
LE: loop exit
PB: predicated region body
PF: predicated region fallthrough
CT: control target
= control target key end

     0   :  { %12 = vsyncpa [#allocation3], 0  ;;  %s3811_s0 = inlined_call_operand.vmem [shape: bf16[2,32,432], index: 0, kind: input, shape index: {}]   ;;  %s3812_s1 = inlined_call_operand.hbm [shape: bf16[64,288], index: 1, kind: input, shape index: {}]   ;;  %s3813_s2 = inlined_call_operand.vmem [shape: f32[64,1], index: 2, kind: input, shape index: {}]   ;;  %s3814_s3 = inlined_call_operand.vmem [shape: f32[1,384], index: 3, kind: input, shape index: {}]   ;;  %s3815_s4 = inlined_call_operand.vmem [shape: f32[32,32], index: 4, kind: input, shape index: {}]   ;;  %s3816_s5 = inlined_call_operand.vmem [shape: f32[32,1], index: 5, kind: input, shape index: {}]   ;;  %s3817_s6 = inlined_call_operand.vmem [shape: f32[64,32], index: 6, kind: input, shape index: {}]   ;;  %s3818_s7 = inlined_call_operand.hbm [shape: f32[2,32,384], index: 7, kind: output, shape index: {}]  }
   0x1   :  { %13 = vsyncpa [#allocation4], 0  ;;  %s2478_s24 = smov [#allocation2]  }
   0x2   :  { %s21_s25 = sshll.u32 %s2478_s24, 4  ;;  %s22_s25 = int_to_ptr.vmem [resolvable:$true] %s21_s25 }
   0x3   :  { %s2442_s26 = scalar_lea.vmem %s22_s25, 1536  ;;  %p2447_p1 = scmp.lt.s32.totalorder %s22_s25, %s22_s25 }
   0x4   :  { %p2443_p0 = scmp.ne.s32.totalorder %s22_s25, %s2442_s26  ;;  %p2448_p2 = scmp.lt.s32.totalorder %s2442_s26, %s2442_s26 }
   0x6   :  { %p2449_p3 = por %p2448_p2, %p2447_p1 }
   0x8   :  { %p2450_p4 = pnand %p2449_p3, %p2443_p0 }
   0xa   :  { %2453 = shalt.err (!%p2450_p4)
}
   0xb   :  { %s2479_s27 = smov 192   ;;  %s2480_s28 = smov 12  }
   0xc   :  { %27 = dma.hbm_to_vmem [thread:$0]  %s3812_s1, 1536, %s22_s25, [#allocation3], %s2479_s27, %s2479_s27, %s2480_s28  }
   0xd   :  { %2474 = dma.done.wait [#allocation3], 1536  }
   0xe   :  { %2475 = vsyncadd [#allocation3], 4294965760  ;;  %v2539_v0 = vld [vmem:[%s3811_s0 + $0x24] ss:$16 sps:$4 sm:$0xff]   ;;  %v2544_v1 = vld [vmem:[%s3811_s0 + $0x20] ss:$16 sps:$4 sm:$0xff]  }
   0xf   :  { %s2481_s12 = smov 90   ;;  %v2551_v2 = vld [vmem:[%s3811_s0 + $0x28] ss:$16 sps:$4 sm:$0xff]   ;;  %v2558_v3 = vld [vmem:[%s3811_s0 + $0x4] ss:$16 sps:$4 sm:$0xff]   ;;  %v2482_v5 = vmov 0  }
  0x10   :  { %301 = vrot.lane.b32.xlu0 %v2539_v0, %s2481_s12  ;;  %299 = vrot.lane.b32.xlu1 %v2544_v1, %s2481_s12  ;;  %v2565_v4 = vld [vmem:[%s3811_s0 + $0x8] ss:$16 sps:$4 sm:$0xff]   ;;  %v2573_v6 = vld [vmem:[%s3811_s0] ss:$16 sps:$4 sm:$0xff]   ;;  %s2483_s24 = smov 110   ;;  %s2484_s10 = smov 126  }
  0x11   :  { %833 = vmatprep.mubr.bf16.mxu1 %v2482_v5  ;;  %2344 = vset.pattern.permute.xlu0 %v2482_v5  ;;  %v2579_v7 = vld [vmem:[%s3811_s0 + $0x60] ss:$16 sps:$4 sm:$0xff]   ;;  %v2585_v8 = vld [vmem:[%s3811_s0 + $0x64] ss:$16 sps:$4 sm:$0xff]   ;;  %v2598_v9 = vld [vmem:[%s3811_s0 + $0x2c] ss:$16 sps:$4 sm:$0xff]  }
  0x12   :  { %2345 = vset.pattern.permute.xlu1 %v2482_v5  ;;  %v2609_v10 = vld [vmem:[%s3811_s0 + $0x40] ss:$16 sps:$4 sm:$0xff]   ;;  %v2616_v11 = vld [vmem:[%s3811_s0 + $0x44] ss:$16 sps:$4 sm:$0xff]   ;;  %v2625_v12 = vld [vmem:[%s3811_s0 + $0xc] ss:$16 sps:$4 sm:$0xff]  }
  0x13   :  { %s2485_s11 = smov 127   ;;  %s2486_s13 = smov 91   ;;  %vm307_vm0 = vcmask 736256   ;;  %v2735_v23 = vld [vmem:[#allocation2 + $0x8] ss:$12 sps:$4 sm:$0xff]   ;;  %vm162_vm1 = vcmask 900096  }
  0x14   :  { %303 = vrot.lane.b32.xlu0 %v2551_v2, %s2481_s12  ;;  %293 = vrot.lane.b32.xlu1 %v2558_v3, %s2481_s12  ;;  %s2487_s14 = smov 92   ;;  %vm715_vm2 = vcmask 261120   ;;  %s2488_s1 = smov 108   ;;  %v2772_v40 = vld [vmem:[#allocation2 + $0x20] ss:$12 sps:$4 sm:$0xff]   ;;  %vm133_vm3 = vcmask 1031168  }
  0x15   :  { %v2791_v48 = vld [vmem:[#allocation2 + $0x38] ss:$12 sps:$4 sm:$0xff]   ;;  %s2489_s15 = smov 109   ;;  %v2807_v56 = vld [vmem:[#allocation2 + $0x50] ss:$12 sps:$4 sm:$0xff]   ;;  %vm104_vm4 = vcmask 1039360  }
  0x16   :  { %v2821_v61 = vld [vmem:[#allocation2 + $0x4] ss:$12 sps:$4 sm:$0xff]   ;;  %vm278_vm5 = vcmask 744448   ;;  %vm249_vm6 = vcmask 752640   ;;  %vm220_vm7 = vcmask 883712   ;;  %vm191_vm8 = vcmask 891904  }
  0x17   :  { %760 = vmatprep.mubr.bf16.mxu0 %v2821_v61 }
  0x18   :  { %295 = vrot.lane.b32.xlu0 %v2565_v4, %s2481_s12  ;;  %291 = vrot.lane.b32.xlu1 %v2573_v6, %s2481_s12 }
  0x1c   :  { %431 = vrot.lane.b32.xlu0 %v2579_v7, %s2483_s24  ;;  %433 = vrot.lane.b32.xlu1 %v2585_v8, %s2483_s24 }
  0x20   :  { %158 = vrot.lane.b32.xlu0 %v2551_v2, %s2483_s24  ;;  %160 = vrot.lane.b32.xlu1 %v2598_v9, %s2483_s24 }
  0x24   :  { %156 = vrot.lane.b32.xlu0 %v2539_v0, %s2483_s24  ;;  %154 = vrot.lane.b32.xlu1 %v2544_v1, %s2483_s24 }
  0x28   :  { %423 = vrot.lane.b32.xlu0 %v2609_v10, %s2483_s24  ;;  %425 = vrot.lane.b32.xlu1 %v2616_v11, %s2483_s24 }
  0x2c   :  { %150 = vrot.lane.b32.xlu0 %v2565_v4, %s2483_s24  ;;  %152 = vrot.lane.b32.xlu1 %v2625_v12, %s2483_s24 }
  0x30   :  { %148 = vrot.lane.b32.xlu0 %v2558_v3, %s2483_s24  ;;  %146 = vrot.lane.b32.xlu1 %v2573_v6, %s2483_s24 }
  0x34   :  { %403 = vrot.lane.b32.xlu0 %v2579_v7, %s2484_s10  ;;  %405 = vrot.lane.b32.xlu1 %v2585_v8, %s2484_s10 }
  0x38   :  { %129 = vrot.lane.b32.xlu0 %v2551_v2, %s2484_s10  ;;  %131 = vrot.lane.b32.xlu1 %v2598_v9, %s2484_s10 }
  0x3c   :  { %127 = vrot.lane.b32.xlu0 %v2539_v0, %s2484_s10  ;;  %125 = vrot.lane.b32.xlu1 %v2544_v1, %s2484_s10 }
  0x40   :  { %395 = vrot.lane.b32.xlu0 %v2609_v10, %s2484_s10  ;;  %397 = vrot.lane.b32.xlu1 %v2616_v11, %s2484_s10 }
  0x44   :  { %121 = vrot.lane.b32.xlu0 %v2565_v4, %s2484_s10  ;;  %123 = vrot.lane.b32.xlu1 %v2625_v12, %s2484_s10 }
  0x48   :  { %119 = vrot.lane.b32.xlu0 %v2558_v3, %s2484_s10  ;;  %117 = vrot.lane.b32.xlu1 %v2573_v6, %s2484_s10 }
  0x4c   :  { %375 = vrot.lane.b32.xlu0 %v2579_v7, %s2485_s11  ;;  %377 = vrot.lane.b32.xlu1 %v2585_v8, %s2485_s11 }
  0x50   :  { %100 = vrot.lane.b32.xlu0 %v2551_v2, %s2485_s11  ;;  %102 = vrot.lane.b32.xlu1 %v2598_v9, %s2485_s11 }
  0x54   :  { %98 = vrot.lane.b32.xlu0 %v2539_v0, %s2485_s11  ;;  %96 = vrot.lane.b32.xlu1 %v2544_v1, %s2485_s11 }
  0x58   :  { %367 = vrot.lane.b32.xlu0 %v2609_v10, %s2485_s11  ;;  %369 = vrot.lane.b32.xlu1 %v2616_v11, %s2485_s11 }
  0x5c   :  { %92 = vrot.lane.b32.xlu0 %v2565_v4, %s2485_s11  ;;  %94 = vrot.lane.b32.xlu1 %v2625_v12, %s2485_s11 }
  0x60   :  { %90 = vrot.lane.b32.xlu0 %v2558_v3, %s2485_s11  ;;  %88 = vrot.lane.b32.xlu1 %v2573_v6, %s2485_s11 }
  0x64   :  { %543 = vrot.lane.b32.xlu0 %v2579_v7, %s2486_s13  ;;  %545 = vrot.lane.b32.xlu1 %v2585_v8, %s2486_s13 }
  0x68   :  { %274 = vrot.lane.b32.xlu0 %v2551_v2, %s2486_s13  ;;  %276 = vrot.lane.b32.xlu1 %v2598_v9, %s2486_s13 }
  0x6c   :  { %272 = vrot.lane.b32.xlu0 %v2539_v0, %s2486_s13  ;;  %270 = vrot.lane.b32.xlu1 %v2544_v1, %s2486_s13 }
  0x70   :  { %535 = vrot.lane.b32.xlu0 %v2609_v10, %s2486_s13  ;;  %537 = vrot.lane.b32.xlu1 %v2616_v11, %s2486_s13 }
  0x74   :  { %266 = vrot.lane.b32.xlu0 %v2565_v4, %s2486_s13  ;;  %268 = vrot.lane.b32.xlu1 %v2625_v12, %s2486_s13 }
  0x78   :  { %264 = vrot.lane.b32.xlu0 %v2558_v3, %s2486_s13  ;;  %262 = vrot.lane.b32.xlu1 %v2573_v6, %s2486_s13 }
  0x7c   :  { %515 = vrot.lane.b32.xlu0 %v2579_v7, %s2487_s14  ;;  %517 = vrot.lane.b32.xlu1 %v2585_v8, %s2487_s14 }
  0x80   :  { %245 = vrot.lane.b32.xlu0 %v2551_v2, %s2487_s14  ;;  %247 = vrot.lane.b32.xlu1 %v2598_v9, %s2487_s14 }
  0x82   :  { %v302_v13 = vpop.permute.xlu0 %301  ;;  %v300_v14 = vpop.permute.xlu1 %299 }
  0x83   :  { %v311_v18 = vsel %vm307_vm0, %v300_v14, %v302_v13 }
  0x84   :  { %243 = vrot.lane.b32.xlu0 %v2539_v0, %s2487_s14  ;;  %241 = vrot.lane.b32.xlu1 %v2544_v1, %s2487_s14 }
  0x86   :  { %v2719_v15 = vpop.permute.xlu0 %303  ;;  %v294_v16 = vpop.permute.xlu1 %293 }
  0x87   :  { %v312_v17 = vsel %vm307_vm0, %v302_v13, %v2719_v15 }
  0x88   :  { %813 = vmatprep.subr.bf16.mxu1 %v312_v17  ;;  %507 = vrot.lane.b32.xlu0 %v2609_v10, %s2487_s14 }
  0x89   :  { %509 = vrot.lane.b32.xlu1 %v2616_v11, %s2487_s14  ;;  %814 = vmatpush1.bf16.msra.mxu1 %v311_v18 }
  0x8a   :  { %v2728_v19 = vpop.permute.xlu0 %295  ;;  %v292_v20 = vpop.permute.xlu1 %291 }
  0x8b   :  { %v309_v21 = vsel %vm307_vm0, %v294_v16, %v2728_v19  ;;  %v308_v22 = vsel %vm307_vm0, %v292_v20, %v294_v16 }
  0x8c   :  { %237 = vrot.lane.b32.xlu0 %v2565_v4, %s2487_s14  ;;  %815 = vmatprep.subr.bf16.mxu1 %v309_v21 }
  0x8d   :  { %239 = vrot.lane.b32.xlu1 %v2625_v12, %s2487_s14  ;;  %816 = vmatpush1.bf16.msra.mxu1 %v308_v22  ;;  %v2845_v22 = vld [vmem:[%s3811_s0 + $0x68] ss:$16 sps:$4 sm:$0xff]  }
  0x8e   :  { %v432_v24 = vpop.permute.xlu0 %431  ;;  %v2739_v25 = vpop.permute.xlu1 %433 }
  0x8f   :  { %v442_v26 = vsel %vm162_vm1, %v432_v24, %v2739_v25  ;;  %v2852_v24 = vld [vmem:[%s3811_s0 + $0x6c] ss:$16 sps:$4 sm:$0xff]  }
  0x90   :  { %235 = vrot.lane.b32.xlu0 %v2558_v3, %s2487_s14  ;;  %2177 = vmatmul.mubr.msk.bf16.vlgmr.msra.gmra.mxu1 %vm715_vm2, %v2735_v23 }
  0x91   :  { %233 = vrot.lane.b32.xlu1 %v2573_v6, %s2487_s14  ;;  %874 = vmatprep.subr.bf16.mxu1 %v442_v26 }
  0x92   :  { %v159_v27 = vpop.permute.xlu0 %158  ;;  %843 = vmatprep.mubr.bf16.mxu1 %v2482_v5  ;;  %v161_v28 = vpop.permute.xlu1 %160 }
  0x93   :  { %v168_v29 = vsel %vm162_vm1, %v159_v27, %v161_v28 }
  0x94   :  { %487 = vrot.lane.b32.xlu0 %v2579_v7, %s2488_s1  ;;  %875 = vmatpush1.bf16.msra.mxu1 %v168_v29  ;;  %v2860_v29 = vld [vmem:[%s3811_s0 + $0x48] ss:$16 sps:$4 sm:$0xff]  }
  0x95   :  { %489 = vrot.lane.b32.xlu1 %v2585_v8, %s2488_s1 }
  0x96   :  { %v157_v30 = vpop.permute.xlu0 %156  ;;  %v155_v31 = vpop.permute.xlu1 %154 }
  0x97   :  { %v167_v32 = vsel %vm162_vm1, %v157_v30, %v159_v27  ;;  %v166_v33 = vsel %vm162_vm1, %v155_v31, %v157_v30  ;;  %v2867_v30 = vld [vmem:[%s3811_s0 + $0x4c] ss:$16 sps:$4 sm:$0xff]  }
  0x98   :  { %728 = vmatprep.subr.bf16.mxu0 %v167_v32  ;;  %216 = vrot.lane.b32.xlu0 %v2551_v2, %s2488_s1 }
  0x99   :  { %218 = vrot.lane.b32.xlu1 %v2598_v9, %s2488_s1  ;;  %729 = vmatpush1.bf16.msra.mxu0 %v166_v33 }
  0x9a   :  { %v424_v34 = vpop.permute.xlu0 %423  ;;  %v2761_v35 = vpop.permute.xlu1 %425  ;;  %2178 = vmatmul.mubr.msk.bf16.gmra.mxu1 %vm715_vm2, %v2772_v40 }
  0x9b   :  { %v439_v36 = vsel %vm162_vm1, %v424_v34, %v2761_v35  ;;  %853 = vmatprep.mubr.bf16.mxu1 %v2482_v5 }
  0x9c   :  { %214 = vrot.lane.b32.xlu0 %v2539_v0, %s2488_s1  ;;  %876 = vmatprep.subr.bf16.mxu1 %v439_v36 }
  0x9d   :  { %212 = vrot.lane.b32.xlu1 %v2544_v1, %s2488_s1 }
  0x9e   :  { %v151_v37 = vpop.permute.xlu0 %150  ;;  %v153_v38 = vpop.permute.xlu1 %152 }
  0x9f   :  { %v165_v39 = vsel %vm162_vm1, %v151_v37, %v153_v38 }
  0xa0   :  { %479 = vrot.lane.b32.xlu0 %v2609_v10, %s2488_s1  ;;  %877 = vmatpush1.bf16.msra.mxu1 %v165_v39 }
  0xa1   :  { %481 = vrot.lane.b32.xlu1 %v2616_v11, %s2488_s1 }
  0xa2   :  { %v149_v41 = vpop.permute.xlu0 %148  ;;  %v147_v42 = vpop.permute.xlu1 %146  ;;  %2179 = vmatmul.mubr.msk.bf16.gmra.mxu1 %vm715_vm2, %v2791_v48 }
  0xa3   :  { %v164_v43 = vsel %vm162_vm1, %v149_v41, %v151_v37  ;;  %v163_v44 = vsel %vm162_vm1, %v147_v42, %v149_v41  ;;  %863 = vmatprep.mubr.bf16.mxu1 %v2482_v5 }
  0xa4   :  { %208 = vrot.lane.b32.xlu0 %v2565_v4, %s2488_s1  ;;  %730 = vmatprep.subr.bf16.mxu0 %v164_v43 }
  0xa5   :  { %210 = vrot.lane.b32.xlu1 %v2625_v12, %s2488_s1  ;;  %731 = vmatpush1.bf16.msra.mxu0 %v163_v44 }
  0xa6   :  { %v404_v45 = vpop.permute.xlu0 %403  ;;  %v2785_v46 = vpop.permute.xlu1 %405 }
  0xa7   :  { %v414_v47 = vsel %vm133_vm3, %v404_v45, %v2785_v46 }
  0xa8   :  { %206 = vrot.lane.b32.xlu0 %v2558_v3, %s2488_s1  ;;  %878 = vmatprep.subr.bf16.mxu1 %v414_v47 }
  0xa9   :  { %204 = vrot.lane.b32.xlu1 %v2573_v6, %s2488_s1 }
  0xaa   :  { %v130_v49 = vpop.permute.xlu0 %129  ;;  %v132_v50 = vpop.permute.xlu1 %131  ;;  %2180 = vmatmul.mubr.msk.bf16.gmra.mxu1 %vm715_vm2, %v2807_v56 }
  0xab   :  { %v139_v51 = vsel %vm133_vm3, %v130_v49, %v132_v50  ;;  %906 = vmatprep.mubr.bf16.mxu1 %v2821_v61 }
  0xac   :  { %459 = vrot.lane.b32.xlu0 %v2579_v7, %s2489_s15  ;;  %879 = vmatpush1.bf16.msra.mxu1 %v139_v51 }
  0xad   :  { %461 = vrot.lane.b32.xlu1 %v2585_v8, %s2489_s15 }
  0xae   :  { %v128_v52 = vpop.permute.xlu0 %127  ;;  %v126_v53 = vpop.permute.xlu1 %125 }
  0xaf   :  { %v138_v54 = vsel %vm133_vm3, %v128_v52, %v130_v49  ;;  %v137_v55 = vsel %vm133_vm3, %v126_v53, %v128_v52 }
  0xb0   :  { %187 = vrot.lane.b32.xlu0 %v2551_v2, %s2489_s15  ;;  %732 = vmatprep.subr.bf16.mxu0 %v138_v54 }
  0xb1   :  { %189 = vrot.lane.b32.xlu1 %v2598_v9, %s2489_s15  ;;  %733 = vmatpush1.bf16.msra.mxu0 %v137_v55 }
  0xb2   :  { %v396_v57 = vpop.permute.xlu0 %395  ;;  %v2813_v58 = vpop.permute.xlu1 %397 }
  0xb3   :  { %v411_v59 = vsel %vm133_vm3, %v396_v57, %v2813_v58 }
  0xb4   :  { %185 = vrot.lane.b32.xlu0 %v2539_v0, %s2489_s15  ;;  %880 = vmatprep.subr.bf16.mxu1 %v411_v59 }
  0xb5   :  { %183 = vrot.lane.b32.xlu1 %v2544_v1, %s2489_s15 }
  0xb6   :  { %v122_v60 = vpop.permute.xlu0 %121  ;;  %v124_v62 = vpop.permute.xlu1 %123 }
  0xb7   :  { %v136_v63 = vsel %vm133_vm3, %v122_v60, %v124_v62 }
  0xb8   :  { %451 = vrot.lane.b32.xlu0 %v2609_v10, %s2489_s15  ;;  %881 = vmatpush1.bf16.msra.mxu1 %v136_v63 }
  0xb9   :  { %453 = vrot.lane.b32.xlu1 %v2616_v11, %s2489_s15 }
  0xba   :  { %v120_v13 = vpop.permute.xlu0 %119  ;;  %v118_v14 = vpop.permute.xlu1 %117 }
  0xbb   :  { %v135_v16 = vsel %vm133_vm3, %v120_v13, %v122_v60  ;;  %v134_v17 = vsel %vm133_vm3, %v118_v14, %v120_v13 }
  0xbc   :  { %179 = vrot.lane.b32.xlu0 %v2565_v4, %s2489_s15  ;;  %734 = vmatprep.subr.bf16.mxu0 %v135_v16 }
  0xbd   :  { %181 = vrot.lane.b32.xlu1 %v2625_v12, %s2489_s15  ;;  %735 = vmatpush1.bf16.msra.mxu0 %v134_v17 }
  0xbe   :  { %v376_v18 = vpop.permute.xlu0 %375  ;;  %v2836_v20 = vpop.permute.xlu1 %377 }
  0xbf   :  { %v386_v21 = vsel %vm104_vm4, %v376_v18, %v2836_v20 }
  0xc0   :  { %177 = vrot.lane.b32.xlu0 %v2558_v3, %s2489_s15  ;;  %882 = vmatprep.subr.bf16.mxu1 %v386_v21 }
  0xc1   :  { %175 = vrot.lane.b32.xlu1 %v2573_v6, %s2489_s15 }
  0xc2   :  { %v101_v26 = vpop.permute.xlu0 %100  ;;  %v103_v27 = vpop.permute.xlu1 %102 }
  0xc3   :  { %v110_v28 = vsel %vm104_vm4, %v101_v26, %v103_v27 }
  0xc4   :  { %435 = vrot.lane.b32.xlu0 %v2845_v22, %s2483_s24  ;;  %883 = vmatpush1.bf16.msra.mxu1 %v110_v28 }
  0xc5   :  { %437 = vrot.lane.b32.xlu1 %v2852_v24, %s2483_s24 }
  0xc6   :  { %v99_v31 = vpop.permute.xlu0 %98  ;;  %v97_v32 = vpop.permute.xlu1 %96 }
  0xc7   :  { %v109_v33 = vsel %vm104_vm4, %v99_v31, %v101_v26  ;;  %v108_v34 = vsel %vm104_vm4, %v97_v32, %v99_v31 }
  0xc8   :  { %427 = vrot.lane.b32.xlu0 %v2860_v29, %s2483_s24  ;;  %736 = vmatprep.subr.bf16.mxu0 %v109_v33 }
  0xc9   :  { %429 = vrot.lane.b32.xlu1 %v2867_v30, %s2483_s24  ;;  %737 = vmatpush1.bf16.msra.mxu0 %v108_v34 }
  0xca   :  { %v368_v36 = vpop.permute.xlu0 %367  ;;  %v2875_v37 = vpop.permute.xlu1 %369 }
  0xcb   :  { %v383_v38 = vsel %vm104_vm4, %v368_v36, %v2875_v37 }
  0xcc   :  { %407 = vrot.lane.b32.xlu0 %v2845_v22, %s2484_s10  ;;  %884 = vmatprep.subr.bf16.mxu1 %v383_v38 }
  0xcd   :  { %409 = vrot.lane.b32.xlu1 %v2852_v24, %s2484_s10 }
  0xce   :  { %v93_v39 = vpop.permute.xlu0 %92  ;;  %v95_v41 = vpop.permute.xlu1 %94 }
  0xcf   :  { %v107_v42 = vsel %vm104_vm4, %v93_v39, %v95_v41 }
  0xd0   :  { %399 = vrot.lane.b32.xlu0 %v2860_v29, %s2484_s10  ;;  %885 = vmatpush1.bf16.msra.mxu1 %v107_v42 }
  0xd1   :  { %401 = vrot.lane.b32.xlu1 %v2867_v30, %s2484_s10  ;;  %886 = vmatprep.subr.bf16.mxu1 %v2579_v7 }
  0xd2   :  { %v91_v43 = vpop.permute.xlu0 %90  ;;  %v89_v44 = vpop.permute.xlu1 %88 }
  0xd3   :  { %v106_v45 = vsel %vm104_vm4, %v91_v43, %v93_v39  ;;  %v105_v47 = vsel %vm104_vm4, %v89_v44, %v91_v43 }
  0xd4   :  { %379 = vrot.lane.b32.xlu0 %v2845_v22, %s2485_s11  ;;  %738 = vmatprep.subr.bf16.mxu0 %v106_v45 }
  0xd5   :  { %381 = vrot.lane.b32.xlu1 %v2852_v24, %s2485_s11  ;;  %887 = vmatpush1.bf16.msra.mxu1 %v2551_v2 }
  0xd6   :  { %739 = vmatpush1.bf16.msra.mxu0 %v105_v47  ;;  %v544_v49 = vpop.permute.xlu0 %543  ;;  %888 = vmatprep.subr.bf16.mxu1 %v2609_v10  ;;  %v2897_v50 = vpop.permute.xlu1 %545 }
  0xd7   :  { %740 = vmatprep.subr.bf16.mxu0 %v2539_v0  ;;  %v554_v51 = vsel %vm278_vm5, %v544_v49, %v2897_v50 }
  0xd8   :  { %371 = vrot.lane.b32.xlu0 %v2860_v29, %s2485_s11 }
  0xd9   :  { %373 = vrot.lane.b32.xlu1 %v2867_v30, %s2485_s11  ;;  %889 = vmatpush1.bf16.msra.mxu1 %v2565_v4 }
  0xda   :  { %741 = vmatpush1.bf16.msra.mxu0 %v2544_v1  ;;  %890 = vmatprep.subr.bf16.mxu1 %v554_v51  ;;  %v275_v2 = vpop.permute.xlu0 %274  ;;  %v277_v52 = vpop.permute.xlu1 %276 }
  0xdb   :  { %742 = vmatprep.subr.bf16.mxu0 %v2558_v3  ;;  %v284_v0 = vsel %vm278_vm5, %v275_v2, %v277_v52  ;;  %v614_v52 = vld [vmem:[%s3813_s2 + $0x38] sm:$0xff] }
  0xdc   :  { %571 = vrot.lane.b32.xlu0 %v2579_v7, %s2481_s12 }
  0xdd   :  { %573 = vrot.lane.b32.xlu1 %v2585_v8, %s2481_s12  ;;  %891 = vmatpush2.bf16.msra.mxu1 %v284_v0 }
  0xde   :  { %743 = vmatpush1.bf16.msra.mxu0 %v2573_v6  ;;  %v273_v53 = vpop.permute.xlu0 %272  ;;  %v271_v4 = vpop.permute.xlu1 %270 }
  0xdf   :  { %v283_v1 = vsel %vm278_vm5, %v273_v53, %v275_v2  ;;  %v282_v3 = vsel %vm278_vm5, %v271_v4, %v273_v53 }
  0xe0   :  { %305 = vrot.lane.b32.xlu0 %v2598_v9, %s2481_s12  ;;  %744 = vmatprep.subr.bf16.mxu0 %v283_v1 }
  0xe1   :  { %563 = vrot.lane.b32.xlu1 %v2609_v10, %s2481_s12 }
  0xe2   :  { %745 = vmatpush2.bf16.msra.mxu0 %v282_v3  ;;  %v536_v7 = vpop.permute.xlu0 %535  ;;  %v2921_v54 = vpop.permute.xlu1 %537  ;;  %v609_v3 = vld [vmem:[%s3813_s2 + $0x10] sm:$0xff] }
  0xe3   :  { %v551_v6 = vsel %vm278_vm5, %v536_v7, %v2921_v54 }
  0xe4   :  { %565 = vrot.lane.b32.xlu0 %v2616_v11, %s2481_s12  ;;  %892 = vmatprep.subr.bf16.mxu1 %v551_v6 }
  0xe5   :  { %297 = vrot.lane.b32.xlu1 %v2625_v12, %s2481_s12 }
  0xe6   :  { %v267_v9 = vpop.permute.xlu0 %266  ;;  %v269_v55 = vpop.permute.xlu1 %268 }
  0xe7   :  { %v281_v57 = vsel %vm278_vm5, %v267_v9, %v269_v55 }
  0xe8   :  { %547 = vrot.lane.b32.xlu0 %v2845_v22, %s2486_s13  ;;  %893 = vmatpush2.bf16.msra.mxu1 %v281_v57  ;;  %v608_v57 = vld [vmem:[%s3813_s2 + $0x8] sm:$0xff] }
  0xe9   :  { %549 = vrot.lane.b32.xlu1 %v2852_v24, %s2486_s13 }
  0xea   :  { %v265_v10 = vpop.permute.xlu0 %264  ;;  %v263_v59 = vpop.permute.xlu1 %262 }
  0xeb   :  { %v280_v60 = vsel %vm278_vm5, %v265_v10, %v267_v9  ;;  %v279_v12 = vsel %vm278_vm5, %v263_v59, %v265_v10  ;;  %v612_v9 = vld [vmem:[%s3813_s2 + $0x28] sm:$0xff] }
  0xec   :  { %539 = vrot.lane.b32.xlu0 %v2860_v29, %s2486_s13  ;;  %746 = vmatprep.subr.bf16.mxu0 %v280_v60  ;;  %v611_v60 = vld [vmem:[%s3813_s2 + $0x20] sm:$0xff] }
  0xed   :  { %541 = vrot.lane.b32.xlu1 %v2867_v30, %s2486_s13  ;;  %747 = vmatpush2.bf16.msra.mxu0 %v279_v12 }
  0xee   :  { %v516_v62 = vpop.permute.xlu0 %515  ;;  %v2940_v63 = vpop.permute.xlu1 %517 }
  0xef   :  { %v526_v13 = vsel %vm249_vm6, %v516_v62, %v2940_v63  ;;  %v607_v62 = vld [vmem:[%s3813_s2] sm:$0xff] }
  0xf0   :  { %519 = vrot.lane.b32.xlu0 %v2845_v22, %s2487_s14  ;;  %894 = vmatprep.subr.bf16.mxu1 %v526_v13 }
  0xf1   :  { %521 = vrot.lane.b32.xlu1 %v2852_v24, %s2487_s14 }
  0xf2   :  { %v246_v14 = vpop.permute.xlu0 %245  ;;  %v248_v16 = vpop.permute.xlu1 %247 }
  0xf3   :  { %v255_v17 = vsel %vm249_vm6, %v246_v14, %v248_v16 }
  0xf4   :  { %511 = vrot.lane.b32.xlu0 %v2860_v29, %s2487_s14  ;;  %895 = vmatpush2.bf16.msra.mxu1 %v255_v17 }
  0xf5   :  { %513 = vrot.lane.b32.xlu1 %v2867_v30, %s2487_s14 }
  0xf6   :  { %v244_v18 = vpop.permute.xlu0 %243  ;;  %v242_v21 = vpop.permute.xlu1 %241 }
  0xf7   :  { %v254_v26 = vsel %vm249_vm6, %v244_v18, %v246_v14  ;;  %v253_v27 = vsel %vm249_vm6, %v242_v21, %v244_v18 }
  0xf8   :  { %491 = vrot.lane.b32.xlu0 %v2845_v22, %s2488_s1  ;;  %748 = vmatprep.subr.bf16.mxu0 %v254_v26 }
  0xf9   :  { %493 = vrot.lane.b32.xlu1 %v2852_v24, %s2488_s1  ;;  %749 = vmatpush2.bf16.msra.mxu0 %v253_v27 }
  0xfa   :  { %v508_v28 = vpop.permute.xlu0 %507 }
  0xfb   :  { %v2959_v31 = vpop.permute.xlu1 %509 }
  0xfc   :  { %483 = vrot.lane.b32.xlu0 %v2860_v29, %s2488_s1  ;;  %v523_v32 = vsel %vm249_vm6, %v508_v28, %v2959_v31 }
  0xfd   :  { %485 = vrot.lane.b32.xlu1 %v2867_v30, %s2488_s1  ;;  %896 = vmatprep.subr.bf16.mxu1 %v523_v32 }
  0xfe   :  { %v238_v33 = vpop.permute.xlu0 %237 }
  0xff   :  { %v240_v34 = vpop.permute.xlu1 %239 }
 0x100   :  { %v252_v36 = vsel %vm249_vm6, %v238_v33, %v240_v34  ;;  %463 = vrot.lane.b32.xlu0 %v2845_v22, %s2489_s15 }
 0x101   :  { %465 = vrot.lane.b32.xlu1 %v2852_v24, %s2489_s15  ;;  %897 = vmatpush2.bf16.msra.mxu1 %v252_v36 }
 0x102   :  { %v236_v38 = vpop.permute.xlu0 %235 }
 0x103   :  { %v234_v39 = vpop.permute.xlu1 %233  ;;  %v251_v41 = vsel %vm249_vm6, %v236_v38, %v238_v33 }
 0x104   :  { %575 = vrot.lane.b32.xlu0 %v2845_v22, %s2481_s12  ;;  %750 = vmatprep.subr.bf16.mxu0 %v251_v41  ;;  %v250_v42 = vsel %vm249_vm6, %v234_v39, %v236_v38 }
 0x105   :  { %577 = vrot.lane.b32.xlu1 %v2852_v24, %s2481_s12  ;;  %751 = vmatpush2.bf16.msra.mxu0 %v250_v42  ;;  %v610_v24 = vld [vmem:[%s3813_s2 + $0x18] sm:$0xff] }
 0x106   :  { %v488_v43 = vpop.permute.xlu0 %487 }
 0x107   :  { %v2978_v44 = vpop.permute.xlu1 %489 }
 0x108   :  { %455 = vrot.lane.b32.xlu0 %v2860_v29, %s2489_s15  ;;  %v498_v45 = vsel %vm220_vm7, %v488_v43, %v2978_v44 }
 0x109   :  { %457 = vrot.lane.b32.xlu1 %v2867_v30, %s2489_s15  ;;  %898 = vmatprep.subr.bf16.mxu1 %v498_v45 }
 0x10a   :  { %v217_v47 = vpop.permute.xlu0 %216 }
 0x10b   :  { %v219_v49 = vpop.permute.xlu1 %218 }
 0x10c   :  { %v226_v51 = vsel %vm220_vm7, %v217_v47, %v219_v49  ;;  %567 = vrot.lane.b32.xlu0 %v2860_v29, %s2481_s12 }
 0x10d   :  { %569 = vrot.lane.b32.xlu1 %v2867_v30, %s2481_s12  ;;  %899 = vmatpush2.bf16.msra.mxu1 %v226_v51  ;;  %v613_v30 = vld [vmem:[%s3813_s2 + $0x30] sm:$0xff] }
 0x10e   :  { %v215_v2 = vpop.permute.xlu0 %214 }
 0x10f   :  { %v213_v0 = vpop.permute.xlu1 %212  ;;  %v225_v53 = vsel %vm220_vm7, %v215_v2, %v217_v47  ;;  %v3036_v47 = vld [vmem:[#allocation2] ss:$12 sps:$4 sm:$0xff]  }
 0x110   :  { %752 = vmatprep.subr.bf16.mxu0 %v225_v53  ;;  %v224_v4 = vsel %vm220_vm7, %v213_v0, %v215_v2  ;;  %632 = vperm.xlu0 %2344, %v610_v24   ;;  %v3039_v2 = vld [vmem:[#allocation2 + $0x1c] ss:$12 sps:$4 sm:$0xff]  }
 0x111   :  { %753 = vmatpush2.bf16.msra.mxu0 %v224_v4  ;;  %652 = vperm.xlu1 %2345, %v614_v52  }
 0x112   :  { %v480_v1 = vpop.permute.xlu0 %479 }
 0x113   :  { %v3005_v7 = vpop.permute.xlu1 %481 }
 0x114   :  { %v495_v6 = vsel %vm220_vm7, %v480_v1, %v3005_v7  ;;  %647 = vperm.xlu0 %2344, %v613_v30  }
 0x115   :  { %900 = vmatprep.subr.bf16.mxu1 %v495_v6  ;;  %627 = vperm.xlu1 %2345, %v609_v3   ;;  %v3049_v3 = vld [vmem:[#allocation2 + $0x18] ss:$12 sps:$4 sm:$0xff]  }
 0x116   :  { %v209_v55 = vpop.permute.xlu0 %208 }
 0x117   :  { %v211_v10 = vpop.permute.xlu1 %210 }
 0x118   :  { %v223_v59 = vsel %vm220_vm7, %v209_v55, %v211_v10  ;;  %642 = vperm.xlu0 %2344, %v612_v9  }
 0x119   :  { %901 = vmatpush2.bf16.msra.mxu1 %v223_v59  ;;  %622 = vperm.xlu1 %2345, %v608_v57  }
 0x11a   :  { %v207_v12 = vpop.permute.xlu0 %206 }
 0x11b   :  { %v205_v13 = vpop.permute.xlu1 %204  ;;  %v222_v14 = vsel %vm220_vm7, %v207_v12, %v209_v55  ;;  %v3053_v55 = vld [vmem:[#allocation2 + $0x34] ss:$12 sps:$4 sm:$0xff]  }
 0x11c   :  { %754 = vmatprep.subr.bf16.mxu0 %v222_v14  ;;  %v221_v16 = vsel %vm220_vm7, %v205_v13, %v207_v12  ;;  %637 = vperm.xlu0 %2344, %v611_v60   ;;  %v3063_v12 = vld [vmem:[#allocation2 + $0x30] ss:$12 sps:$4 sm:$0xff]   ;;  %v3067_v14 = vld [vmem:[#allocation2 + $0x4c] ss:$12 sps:$4 sm:$0xff]  }
 0x11d   :  { %755 = vmatpush2.bf16.msra.mxu0 %v221_v16  ;;  %617 = vperm.xlu1 %2345, %v607_v62  }
 0x11e   :  { %v460_v17 = vpop.permute.xlu0 %459 }
 0x11f   :  { %v3024_v18 = vpop.permute.xlu1 %461 }
 0x120   :  { %v470_v21 = vsel %vm191_vm8, %v460_v17, %v3024_v18 }
 0x121   :  { %902 = vmatprep.subr.bf16.mxu1 %v470_v21 }
 0x122   :  { %v188_v26 = vpop.permute.xlu0 %187 }
 0x123   :  { %v190_v27 = vpop.permute.xlu1 %189 }
 0x124   :  { %v197_v28 = vsel %vm191_vm8, %v188_v26, %v190_v27  ;;  %v3077_v27 = vld [vmem:[#allocation2 + $0x48] ss:$12 sps:$4 sm:$0xff]  }
 0x125   :  { %903 = vmatpush2.bf16.msra.mxu1 %v197_v28 }
 0x126   :  { %v186_v32 = vpop.permute.xlu0 %185 }
 0x127   :  { %v184_v33 = vpop.permute.xlu1 %183  ;;  %v196_v34 = vsel %vm191_vm8, %v186_v32, %v188_v26 }
 0x128   :  { %756 = vmatprep.subr.bf16.mxu0 %v196_v34  ;;  %v195_v36 = vsel %vm191_vm8, %v184_v33, %v186_v32 }
 0x129   :  { %757 = vmatpush2.bf16.msra.mxu0 %v195_v36 }
 0x12a   :  { %v452_v38 = vpop.permute.xlu0 %451 }
 0x12b   :  { %v3031_v39 = vpop.permute.xlu1 %453 }
 0x12c   :  { %v467_v41 = vsel %vm191_vm8, %v452_v38, %v3031_v39 }
 0x12d   :  { %904 = vmatprep.subr.bf16.mxu1 %v467_v41 }
 0x12e   :  { %v180_v42 = vpop.permute.xlu0 %179 }
 0x12f   :  { %v182_v43 = vpop.permute.xlu1 %181 }
 0x130   :  { %v194_v45 = vsel %vm191_vm8, %v180_v42, %v182_v43 }
 0x131   :  { %905 = vmatpush2.bf16.msra.mxu1 %v194_v45 }
 0x132   :  { %v178_v49 = vpop.permute.xlu0 %177 }
 0x133   :  { %v176_v51 = vpop.permute.xlu1 %175  ;;  %v193_v24 = vsel %vm191_vm8, %v178_v49, %v180_v42 }
 0x134   :  { %758 = vmatprep.subr.bf16.mxu0 %v193_v24  ;;  %v192_v52 = vsel %vm191_vm8, %v176_v51, %v178_v49  ;;  %907 = vmatmul.mubr.bf16.vlgmr.msra.gmra.mxu1 %v3036_v47 }
 0x135   :  { %759 = vmatpush2.bf16.msra.mxu0 %v192_v52  ;;  %916 = vmatprep.mubr.bf16.mxu1 %v3039_v2 }
 0x136   :  { %v436_v0 = vpop.permute.xlu0 %435 }
 0x137   :  { %v443_v53 = vsel %vm162_vm1, %v2739_v25, %v436_v0  ;;  %v438_v4 = vpop.permute.xlu1 %437 }
 0x138   :  { %761 = vmatmul.mubr.bf16.vlgmr.msra.gmra.mxu0 %v3036_v47  ;;  %v444_v30 = vsel %vm162_vm1, %v436_v0, %v438_v4 }
 0x139   :  { %1020 = vmatprep.subr.bf16.mxu1 %v444_v30  ;;  %770 = vmatprep.mubr.bf16.mxu0 %v3039_v2 }
 0x13a   :  { %1021 = vmatpush1.bf16.msra.mxu1 %v443_v53  ;;  %v428_v1 = vpop.permute.xlu0 %427 }
 0x13b   :  { %v440_v6 = vsel %vm162_vm1, %v2761_v35, %v428_v1  ;;  %v430_v9 = vpop.permute.xlu1 %429 }
 0x13c   :  { %v441_v25 = vsel %vm162_vm1, %v428_v1, %v430_v9  ;;  %917 = vmatmul.mubr.bf16.gmra.mxu1 %v3049_v3 }
 0x13d   :  { %1022 = vmatprep.subr.bf16.mxu1 %v441_v25  ;;  %926 = vmatprep.mubr.bf16.mxu1 %v3053_v55 }
 0x13e   :  { %1023 = vmatpush1.bf16.msra.mxu1 %v440_v6  ;;  %v408_v57 = vpop.permute.xlu0 %407 }
 0x13f   :  { %v415_v10 = vsel %vm133_vm3, %v2785_v46, %v408_v57  ;;  %v410_v59 = vpop.permute.xlu1 %409 }
 0x140   :  { %771 = vmatmul.mubr.bf16.gmra.mxu0 %v3049_v3  ;;  %v416_v35 = vsel %vm133_vm3, %v408_v57, %v410_v59 }
 0x141   :  { %1024 = vmatprep.subr.bf16.mxu1 %v416_v35  ;;  %780 = vmatprep.mubr.bf16.mxu0 %v3053_v55 }
 0x142   :  { %1025 = vmatpush1.bf16.msra.mxu1 %v415_v10  ;;  %v400_v60 = vpop.permute.xlu0 %399 }
 0x143   :  { %v412_v62 = vsel %vm133_vm3, %v2813_v58, %v400_v60  ;;  %v402_v13 = vpop.permute.xlu1 %401 }
 0x144   :  { %v413_v46 = vsel %vm133_vm3, %v400_v60, %v402_v13  ;;  %927 = vmatmul.mubr.bf16.gmra.mxu1 %v3063_v12 }
 0x145   :  { %1026 = vmatprep.subr.bf16.mxu1 %v413_v46  ;;  %936 = vmatprep.mubr.bf16.mxu1 %v3067_v14 }
 0x146   :  { %1027 = vmatpush1.bf16.msra.mxu1 %v412_v62  ;;  %v380_v16 = vpop.permute.xlu0 %379 }
 0x147   :  { %v387_v17 = vsel %vm104_vm4, %v2836_v20, %v380_v16  ;;  %v382_v21 = vpop.permute.xlu1 %381 }
 0x148   :  { %781 = vmatmul.mubr.bf16.gmra.mxu0 %v3063_v12  ;;  %v388_v58 = vsel %vm104_vm4, %v380_v16, %v382_v21 }
 0x149   :  { %1028 = vmatprep.subr.bf16.mxu1 %v388_v58  ;;  %790 = vmatprep.mubr.bf16.mxu0 %v3067_v14 }
 0x14a   :  { %1029 = vmatpush1.bf16.msra.mxu1 %v387_v17  ;;  %v372_v26 = vpop.permute.xlu0 %371 }
 0x14b   :  { %v384_v28 = vsel %vm104_vm4, %v2875_v37, %v372_v26  ;;  %v374_v32 = vpop.permute.xlu1 %373 }
 0x14c   :  { %v385_v33 = vsel %vm104_vm4, %v372_v26, %v374_v32  ;;  %937 = vmatmul.mubr.bf16.gmra.mxu1 %v3077_v27 }
 0x14d   :  { %1030 = vmatprep.subr.bf16.mxu1 %v385_v33  ;;  %1052 = vmatprep.mubr.bf16.mxu1 %v2821_v61 }
 0x14e   :  { %1031 = vmatpush1.bf16.msra.mxu1 %v384_v28  ;;  %v572_v20 = vpop.permute.xlu0 %571 }
 0x14f   :  { %v3084_v34 = vpop.permute.xlu1 %573  ;;  %1032 = vmatprep.subr.bf16.mxu1 %v2845_v22 }
 0x150   :  { %791 = vmatmul.mubr.bf16.gmra.mxu0 %v3077_v27  ;;  %v582_v36 = vsel %vm307_vm0, %v572_v20, %v3084_v34 }
 0x151   :  { %959 = vmatprep.subr.bf16.mxu0 %v582_v36  ;;  %979 = vmatprep.mubr.bf16.mxu0 %v2482_v5 }
 0x152   :  { %v306_v37 = vpop.permute.xlu0 %305  ;;  %1033 = vmatpush1.bf16.msra.mxu1 %v2585_v8 }
 0x153   :  { %v313_v61 = vsel %vm307_vm0, %v2719_v15, %v306_v37  ;;  %v564_v38 = vpop.permute.xlu1 %563  ;;  %1034 = vmatprep.subr.bf16.mxu1 %v2860_v29 }
 0x154   :  { %960 = vmatpush1.bf16.msra.mxu0 %v313_v61 }
 0x156   :  { %v3095_v41 = vpop.permute.xlu0 %565  ;;  %1035 = vmatpush1.bf16.msra.mxu1 %v2616_v11 }
 0x157   :  { %v298_v22 = vpop.permute.xlu1 %297  ;;  %v579_v42 = vsel %vm307_vm0, %v564_v38, %v3095_v41 }
 0x158   :  { %v310_v43 = vsel %vm307_vm0, %v2728_v19, %v298_v22  ;;  %961 = vmatprep.subr.bf16.mxu0 %v579_v42 }
 0x159   :  { %962 = vmatpush1.bf16.msra.mxu0 %v310_v43 }
 0x15a   :  { %v548_v8 = vpop.permute.xlu0 %547 }
 0x15b   :  { %v555_v15 = vsel %vm278_vm5, %v2897_v50, %v548_v8  ;;  %v550_v45 = vpop.permute.xlu1 %549 }
 0x15c   :  { %2181 = vmatmul.mubr.msk.bf16.vlgmr.msra.gmra.mxu0 %vm715_vm2, %v2735_v23  ;;  %v556_v29 = vsel %vm278_vm5, %v548_v8, %v550_v45 }
 0x15d   :  { %1036 = vmatprep.subr.bf16.mxu1 %v556_v29  ;;  %989 = vmatprep.mubr.bf16.mxu0 %v2482_v5 }
 0x15e   :  { %1037 = vmatpush2.bf16.msra.mxu1 %v555_v15  ;;  %v540_v11 = vpop.permute.xlu0 %539 }
 0x15f   :  { %v552_v19 = vsel %vm278_vm5, %v2921_v54, %v540_v11  ;;  %v542_v49 = vpop.permute.xlu1 %541 }
 0x160   :  { %v553_v51 = vsel %vm278_vm5, %v540_v11, %v542_v49 }
 0x161   :  { %1038 = vmatprep.subr.bf16.mxu1 %v553_v51 }
 0x162   :  { %1039 = vmatpush2.bf16.msra.mxu1 %v552_v19  ;;  %v520_v50 = vpop.permute.xlu0 %519 }
 0x163   :  { %v527_v24 = vsel %vm249_vm6, %v2940_v63, %v520_v50  ;;  %v522_v52 = vpop.permute.xlu1 %521 }
 0x164   :  { %2182 = vmatmul.mubr.msk.bf16.gmra.mxu0 %vm715_vm2, %v2772_v40  ;;  %v528_v0 = vsel %vm249_vm6, %v520_v50, %v522_v52 }
 0x165   :  { %1040 = vmatprep.subr.bf16.mxu1 %v528_v0  ;;  %999 = vmatprep.mubr.bf16.mxu0 %v2482_v5 }
 0x166   :  { %1041 = vmatpush2.bf16.msra.mxu1 %v527_v24  ;;  %v512_v54 = vpop.permute.xlu0 %511 }
 0x167   :  { %v524_v53 = vsel %vm249_vm6, %v2959_v31, %v512_v54  ;;  %v514_v4 = vpop.permute.xlu1 %513 }
 0x168   :  { %v525_v30 = vsel %vm249_vm6, %v512_v54, %v514_v4  ;;  %v1216_v54 = vlaneseq }
 0x169   :  { %1042 = vmatprep.subr.bf16.mxu1 %v525_v30 }
 0x16a   :  { %1043 = vmatpush2.bf16.msra.mxu1 %v524_v53  ;;  %v492_v63 = vpop.permute.xlu0 %491 }
 0x16b   :  { %v499_v1 = vsel %vm220_vm7, %v2978_v44, %v492_v63  ;;  %v494_v6 = vpop.permute.xlu1 %493 }
 0x16c   :  { %2183 = vmatmul.mubr.msk.bf16.gmra.mxu0 %vm715_vm2, %v2791_v48  ;;  %v500_v9 = vsel %vm220_vm7, %v492_v63, %v494_v6 }
 0x16d   :  { %1044 = vmatprep.subr.bf16.mxu1 %v500_v9  ;;  %1009 = vmatprep.mubr.bf16.mxu0 %v2482_v5  ;;  %v1217_v9 = vshrl.u32 %v1216_v54, 7 }
 0x16e   :  { %1045 = vmatpush2.bf16.msra.mxu1 %v499_v1  ;;  %v484_v31 = vpop.permute.xlu0 %483 }
 0x16f   :  { %v496_v25 = vsel %vm220_vm7, %v3005_v7, %v484_v31  ;;  %v486_v57 = vpop.permute.xlu1 %485 }
 0x170   :  { %v497_v10 = vsel %vm220_vm7, %v484_v31, %v486_v57 }
 0x171   :  { %1046 = vmatprep.subr.bf16.mxu1 %v497_v10 }
 0x172   :  { %1047 = vmatpush2.bf16.msra.mxu1 %v496_v25  ;;  %v464_v44 = vpop.permute.xlu0 %463 }
 0x173   :  { %v471_v59 = vsel %vm191_vm8, %v3024_v18, %v464_v44  ;;  %v466_v35 = vpop.permute.xlu1 %465 }
 0x174   :  { %2184 = vmatmul.mubr.msk.bf16.gmra.mxu0 %vm715_vm2, %v2807_v56  ;;  %v472_v60 = vsel %vm191_vm8, %v464_v44, %v466_v35  ;;  %v1222_v44 = vsub.s32 1, %v1217_v9  ;;  %v1218_v35 = vsub.s32 0, %v1217_v9 }
 0x175   :  { %1048 = vmatprep.subr.bf16.mxu1 %v472_v60  ;;  %1125 = vmatprep.mubr.bf16.mxu0 %v2482_v5 }
 0x176   :  { %1049 = vmatpush2.bf16.msra.mxu1 %v471_v59  ;;  %v576_v7 = vpop.permute.xlu0 %575 }
 0x177   :  { %v583_v62 = vsel %vm307_vm0, %v3084_v34, %v576_v7  ;;  %v578_v13 = vpop.permute.xlu1 %577 }
 0x178   :  { %v584_v46 = vsel %vm307_vm0, %v576_v7, %v578_v13 }
 0x179   :  { %1105 = vmatprep.subr.bf16.mxu0 %v584_v46 }
 0x17a   :  { %1106 = vmatpush1.bf16.msra.mxu0 %v583_v62  ;;  %v456_v18 = vpop.permute.xlu0 %455  ;;  %v1214_v62 = vld [vmem:[%s3814_s3] sm:$0x7] }
 0x17b   :  { %v468_v16 = vsel %vm191_vm8, %v3031_v39, %v456_v18  ;;  %v458_v17 = vpop.permute.xlu1 %457 }
 0x17c   :  { %v469_v21 = vsel %vm191_vm8, %v456_v18, %v458_v17 }
 0x17d   :  { %1050 = vmatprep.subr.bf16.mxu1 %v469_v21 }
 0x17e   :  { %1051 = vmatpush2.bf16.msra.mxu1 %v468_v16  ;;  %v568_v58 = vpop.permute.xlu0 %567  ;;  %v3232_v16 = vrot.slane %v1214_v62, %v1222_v44 }
 0x17f   :  { %v580_v26 = vsel %vm307_vm0, %v3095_v41, %v568_v58  ;;  %v570_v28 = vpop.permute.xlu1 %569 }
 0x180   :  { %v581_v32 = vsel %vm307_vm0, %v568_v58, %v570_v28  ;;  %v3239_v28 = vrot.slane %v1214_v62, %v1218_v35 }
 0x181   :  { %1053 = vmatmul.mubr.bf16.vlgmr.msra.gmra.mxu1 %v3036_v47  ;;  %1107 = vmatprep.subr.bf16.mxu0 %v581_v32 }
 0x182   :  { %1108 = vmatpush1.bf16.msra.mxu0 %v580_v26  ;;  %1062 = vmatprep.mubr.bf16.mxu1 %v3039_v2  ;;  %v1226_v26 = vsub.s32 2, %v1217_v9 }
 0x185   :  { %2185 = vmatmul.mubr.msk.bf16.vlgmr.msra.gmra.mxu0 %vm715_vm2, %v2735_v23  ;;  %v835_v23 = vpop.f32.mrf.mxu1 }
 0x186   :  { %1135 = vmatprep.mubr.bf16.mxu0 %v2482_v5 }
 0x187   :  { %v837_v39 = vpop.f32.mrf.mxu1 }
 0x189   :  { %1063 = vmatmul.mubr.bf16.gmra.mxu1 %v3049_v3  ;;  %v3162_v47 = vpop.f32.mrf.mxu1 }
 0x18a   :  { %1072 = vmatprep.mubr.bf16.mxu1 %v3053_v55 }
 0x18b   :  { %v3202_v0 = vpop.permute.xlu0 %632 }
 0x18c   :  { %v3188_v38 = vpop.permute.xlu1 %652 }
 0x18d   :  { %2186 = vmatmul.mubr.msk.bf16.gmra.mxu0 %vm715_vm2, %v2772_v40  ;;  %v841_v40 = vpop.f32.mrf.mxu1 }
 0x18e   :  { %1145 = vmatprep.mubr.bf16.mxu0 %v2482_v5 }
 0x18f   :  { %v3164_v2 = vpop.f32.mrf.mxu1  ;;  %v3216_v25 = vpop.permute.xlu0 %647 }
 0x190   :  { %v3192_v15 = vpop.permute.xlu1 %627 }
 0x191   :  { %1073 = vmatmul.mubr.bf16.gmra.mxu1 %v3063_v12  ;;  %v3166_v3 = vpop.f32.mrf.mxu1 }
 0x192   :  { %1082 = vmatprep.mubr.bf16.mxu1 %v3067_v14 }
 0x193   :  { %v3168_v55 = vpop.f32.mrf.mxu1  ;;  %v3237_v58 = vpop.permute.xlu0 %642 }
 0x194   :  { %v3196_v49 = vpop.permute.xlu1 %622 }
 0x195   :  { %2187 = vmatmul.mubr.msk.bf16.gmra.mxu0 %vm715_vm2, %v2791_v48  ;;  %v3170_v12 = vpop.f32.mrf.mxu1 }
 0x196   :  { %1155 = vmatprep.mubr.bf16.mxu0 %v2482_v5 }
 0x197   :  { %v3172_v48 = vpop.f32.mrf.mxu1 }
 0x198   :  { %v3206_v4 = vpop.permute.xlu1 %617 }
 0x199   :  { %1083 = vmatmul.mubr.bf16.gmra.mxu1 %v3077_v27  ;;  %v3174_v5 = vpop.f32.mrf.mxu1 }
 0x19b   :  { %v3176_v14 = vpop.f32.mrf.mxu1 }
 0x19d   :  { %2188 = vmatmul.mubr.msk.bf16.gmra.mxu0 %vm715_vm2, %v2807_v56  ;;  %v3178_v56 = vpop.f32.mrf.mxu1 }
 0x19f   :  { %v3180_v27 = vpop.f32.mrf.mxu1 }
 0x1a1   :  { %v3182_v33 = vpop.f32.mrf.mxu1 }
 0x1a3   :  { %v3184_v20 = vpop.f32.mrf.mxu1 }
 0x1a5   :  { %v3186_v36 = vpop.f32.mrf.mxu1 }
 0x1f4   :  { %v908_v41 = vpop.f32.mrf.mxu1 }
 0x1f6   :  { %v3190_v43 = vpop.f32.mrf.mxu1 }
 0x1f8   :  { %v762_v34 = vpop.f32.mrf.mxu0  ;;  %v912_v29 = vpop.f32.mrf.mxu1 }
 0x1f9   :  { %v763_v6 = vadd.f32 %v762_v34, %v3206_v4  ;;  %v909_v34 = vadd.f32 %v908_v41, %v3206_v4 }
 0x1fa   :  { %v764_v37 = vpop.f32.mrf.mxu0  ;;  %v3198_v51 = vpop.f32.mrf.mxu1 }
 0x1fb   :  { %v765_v63 = vadd.f32 %v764_v37, %v3206_v4  ;;  %v3223_v7 = vadd.f32 %v835_v23, %v763_v6 }
 0x1fc   :  { %v766_v61 = vpop.f32.mrf.mxu0  ;;  %v918_v24 = vpop.f32.mrf.mxu1 }
 0x1fd   :  { %v3218_v10 = vadd.f32 %v837_v39, %v765_v63  ;;  %v767_v13 = vadd.f32 %v766_v61, %v3196_v49  ;;  %v3821_v23 = vmax.f32 %v3223_v7, 0.0 }
 0x1fe   :  { %v768_v22 = vpop.f32.mrf.mxu0  ;;  %v3208_v30 = vpop.f32.mrf.mxu1 }
 0x1ff   :  { %v769_v59 = vadd.f32 %v768_v22, %v3196_v49  ;;  %v3819_v18 = vmax.f32 %v3218_v10, 0.0  ;;  %v3245_v39 = vadd.f32 %v3162_v47, %v767_v13  ;;  %v3259_v47 = vrot.slane %v1214_v62, %v1226_v26 }
 0x200   :  { %v772_v42 = vpop.f32.mrf.mxu0  ;;  %v922_v57 = vpop.f32.mrf.mxu1  ;;  %v1231_v9 = vmul.f32 %v3239_v28, %v3821_v23 }
 0x201   :  { %v3234_v17 = vadd.f32 %v841_v40, %v769_v59  ;;  %v773_v37 = vadd.f32 %v772_v42, %v3192_v15  ;;  %v1232_v61 = vmul.f32 %v3232_v16, %v3819_v18  ;;  %v3272_v59 = vpop.permute.xlu0 %637 }
 0x202   :  { %v774_v8 = vpop.f32.mrf.mxu0  ;;  %v3229_v46 = vpop.f32.mrf.mxu1 }
 0x203   :  { %v775_v21 = vadd.f32 %v774_v8, %v3192_v15  ;;  %v3822_v54 = vmax.f32 %v3234_v17, 0.0  ;;  %v3269_v44 = vadd.f32 %v3164_v2, %v773_v37 }
 0x204   :  { %v776_v45 = vpop.f32.mrf.mxu0  ;;  %v928_v40 = vpop.f32.mrf.mxu1 }
 0x205   :  { %v3255_v63 = vadd.f32 %v3166_v3, %v775_v21  ;;  %v777_v41 = vadd.f32 %v776_v45, %v3202_v0  ;;  %v913_v3 = vadd.f32 %v912_v29, %v3196_v49  ;;  %v919_v21 = vadd.f32 %v918_v24, %v3192_v15 }
 0x206   :  { %v778_v11 = vpop.f32.mrf.mxu0  ;;  %v3275_v62 = vpop.f32.mrf.mxu1  ;;  %v1235_v2 = vmul.f32 %v3232_v16, %v3822_v54 }
 0x207   :  { %v779_v22 = vadd.f32 %v778_v11, %v3202_v0  ;;  %3874 = vst [vmem:[#allocation8_spill] sm:$0xff] %v3255_v63  ;;  %v3832_v11 = vmax.f32 %v3245_v39, 0.0  ;;  %v3823_v29 = vmax.f32 %v3255_v63, 0.0 }
 0x208   :  { %v3194_v19 = vpop.f32.mrf.mxu0 }
 0x209   :  { %v3278_v45 = vadd.f32 %v3170_v12, %v779_v22  ;;  %v3292_v12 = vadd.f32 %v3168_v55, %v777_v41  ;;  %v3825_v22 = vmax.f32 %v3269_v44, 0.0  ;;  %v923_v41 = vadd.f32 %v922_v57, %v3202_v0 }
 0x20a   :  { %v784_v50 = vpop.f32.mrf.mxu0  ;;  %v1238_v23 = vmul.f32 %v3232_v16, %v3823_v29 }
 0x20b   :  { %v785_v13 = vadd.f32 %v784_v50, %v3272_v59  ;;  %v783_v50 = vadd.f32 %v3194_v19, %v3272_v59  ;;  %v1237_v29 = vmul.f32 %v3239_v28, %v3825_v22 }
 0x20c   :  { %v3200_v52 = vpop.f32.mrf.mxu0 }
 0x20d   :  { %v3305_v55 = vadd.f32 %v3174_v5, %v785_v13  ;;  %v3828_v5 = vmax.f32 %v3292_v12, 0.0  ;;  %v3320_v13 = vadd.f32 %v3172_v48, %v783_v50  ;;  %v1263_v22 = vadd.f32 %v1238_v23, %v1237_v29 }
 0x20e   :  { %v3204_v53 = vpop.f32.mrf.mxu0 }
 0x20f   :  { %v789_v19 = vadd.f32 %v3204_v53, %v3237_v58  ;;  %v787_v53 = vadd.f32 %v3200_v52, %v3237_v58  ;;  %v3829_v48 = vmax.f32 %v3305_v55, 0.0  ;;  %v929_v52 = vadd.f32 %v928_v40, %v3272_v59 }
 0x210   :  { %v3211_v1 = vpop.f32.mrf.mxu0 }
 0x211   :  { %v3352_v40 = vadd.f32 %v3176_v14, %v787_v53  ;;  %v1244_v23 = vmul.f32 %v3232_v16, %v3829_v48 }
 0x212   :  { %v3214_v31 = vpop.f32.mrf.mxu0 }
 0x214   :  { %v3221_v60 = vpop.f32.mrf.mxu0 }
 0x216   :  { %v3241_v32 = vpop.f32.mrf.mxu0 }
 0x21c   :  { %v981_v8 = vpop.f32.mrf.mxu0 }
 0x21d   :  { %v3257_v6 = vadd.f32 %v981_v8, %v909_v34  ;;  %v1255_v34 = vadd.f32 %v1232_v61, %v1231_v9  ;;  %v1234_v61 = vmul.f32 %v3239_v28, %v3832_v11 }
 0x21e   :  { %v3262_v42 = vpop.f32.mrf.mxu0 }
 0x21f   :  { %v3820_v35 = vmax.f32 %v3257_v6, 0.0  ;;  %v1259_v54 = vadd.f32 %v1235_v2, %v1234_v61  ;;  %v3337_v2 = vadd.f32 %v3178_v56, %v789_v19  ;;  %v795_v61 = vadd.f32 %v3214_v31, %v3216_v25 }
 0x220   :  { %v985_v26 = vpop.f32.mrf.mxu0  ;;  %v3831_v56 = vmax.f32 %v3320_v13, 0.0  ;;  %v793_v31 = vadd.f32 %v3211_v1, %v3216_v25  ;;  %v799_v1 = vadd.f32 %v3241_v32, %v3188_v38  ;;  %v797_v32 = vadd.f32 %v3221_v60, %v3188_v38 }
 0x221   :  { %v1233_v37 = vmul.f32 %v3259_v47, %v3820_v35  ;;  %v3289_v8 = vadd.f32 %v985_v26, %v913_v3  ;;  %v932_v35 = vpop.f32.mrf.mxu1  ;;  %v3826_v3 = vmax.f32 %v3278_v45, 0.0  ;;  %v3834_v29 = vmax.f32 %v3337_v2, 0.0 }
 0x222   :  { %v3296_v24 = vpop.f32.mrf.mxu0  ;;  %v3365_v53 = vadd.f32 %v3182_v33, %v795_v61  ;;  %v1243_v48 = vmul.f32 %v3239_v28, %v3831_v56  ;;  %v3381_v33 = vadd.f32 %v3180_v27, %v793_v31  ;;  %v3394_v27 = vadd.f32 %v3186_v36, %v799_v1 }
 0x223   :  { %v3824_v9 = vmax.f32 %v3289_v8, 0.0  ;;  %v1256_v18 = vadd.f32 %v1255_v34, %v1233_v37 }
 0x224   :  { %v991_v26 = vpop.f32.mrf.mxu0  ;;  %3876 = vst [vmem:[#allocation10_spill] sm:$0xff] %v3365_v53  ;;  %3877 = vst [vmem:[#allocation11_spill] sm:$0xff] %v3381_v33  ;;  %v1271_v56 = vadd.f32 %v1244_v23, %v1243_v48  ;;  %v3836_v11 = vmax.f32 %v3365_v53, 0.0  ;;  %v3837_v48 = vmax.f32 %v3381_v33, 0.0 }
 0x225   :  { %v1236_v34 = vmul.f32 %v3259_v47, %v3824_v9  ;;  %v3316_v37 = vadd.f32 %v991_v26, %v919_v21  ;;  %1257 = vadd.xlane.f32.xlu0 %v1256_v18  ;;  %v3330_v26 = vpop.f32.mrf.mxu1  ;;  %v1241_v18 = vmul.f32 %v3232_v16, %v3826_v3  ;;  %v1240_v3 = vmul.f32 %v3239_v28, %v3828_v5 }
 0x226   :  { %v3324_v57 = vpop.f32.mrf.mxu0  ;;  %3878 = vst [vmem:[#allocation12_spill] sm:$0xff] %v3394_v27 }
 0x227   :  { %3875 = vst [vmem:[#allocation9_spill] sm:$0xff] %v3316_v37  ;;  %v3827_v9 = vmax.f32 %v3316_v37, 0.0  ;;  %v1260_v21 = vadd.f32 %v1259_v54, %v1236_v34  ;;  %v1267_v14 = vadd.f32 %v1241_v18, %v1240_v3 }
 0x228   :  { %v995_v50 = vpop.f32.mrf.mxu0 }
 0x229   :  { %v1239_v54 = vmul.f32 %v3259_v47, %v3827_v9  ;;  %v3345_v34 = vadd.f32 %v995_v50, %v923_v41  ;;  %1261 = vadd.xlane.f32.xlu0 %v1260_v21  ;;  %v938_v50 = vpop.f32.mrf.mxu1  ;;  %v933_v21 = vadd.f32 %v932_v35, %v3237_v58  ;;  %v3835_v35 = vmax.f32 %v3352_v40, 0.0 }
 0x22a   :  { %v3354_v19 = vpop.f32.mrf.mxu0 }
 0x22b   :  { %v3830_v9 = vmax.f32 %v3345_v34, 0.0  ;;  %v1264_v41 = vadd.f32 %v1263_v22, %v1239_v54  ;;  %v3386_v61 = vpop.f32.mrf.mxu1 }
 0x22c   :  { %v1001_v5 = vpop.f32.mrf.mxu0 }
 0x22d   :  { %v1242_v22 = vmul.f32 %v3259_v47, %v3830_v9  ;;  %v3372_v54 = vadd.f32 %v1001_v5, %v929_v52  ;;  %1265 = vadd.xlane.f32.xlu0 %v1264_v41  ;;  %v1247_v52 = vmul.f32 %v3232_v16, %v3834_v29  ;;  %v939_v41 = vadd.f32 %v938_v50, %v3216_v25  ;;  %v942_v23 = vpop.f32.mrf.mxu1 }
 0x22e   :  { %v3378_v3 = vpop.f32.mrf.mxu0  ;;  %v3408_v50 = vadd.f32 %v3184_v20, %v797_v32  ;;  %v3839_v29 = vmax.f32 %v3394_v27, 0.0 }
 0x22f   :  { %v3833_v18 = vmax.f32 %v3372_v54, 0.0  ;;  %v1268_v5 = vadd.f32 %v1267_v14, %v1242_v22  ;;  %v1246_v14 = vmul.f32 %v3239_v28, %v3835_v35 }
 0x230   :  { %v1005_v9 = vpop.f32.mrf.mxu0 }
 0x231   :  { %v1245_v60 = vmul.f32 %v3259_v47, %v3833_v18  ;;  %v3399_v31 = vadd.f32 %v1005_v9, %v933_v21  ;;  %1269 = vadd.xlane.f32.xlu1 %v1268_v5  ;;  %v943_v18 = vadd.f32 %v942_v23, %v3188_v38  ;;  %v1275_v21 = vadd.f32 %v1247_v52, %v1246_v14 }
 0x232   :  { %v3404_v22 = vpop.f32.mrf.mxu0  ;;  %v1250_v5 = vmul.f32 %v3232_v16, %v3836_v11  ;;  %v3842_v52 = vmax.f32 %v3408_v50, 0.0  ;;  %v1253_v11 = vmul.f32 %v3232_v16, %v3839_v29 }
 0x233   :  { %v3838_v36 = vmax.f32 %v3399_v31, 0.0  ;;  %v1272_v1 = vadd.f32 %v1271_v56, %v1245_v60  ;;  %v1249_v56 = vmul.f32 %v3239_v28, %v3837_v48 }
 0x234   :  { %v1011_v9 = vpop.f32.mrf.mxu0  ;;  %v1252_v48 = vmul.f32 %v3239_v28, %v3842_v52 }
 0x235   :  { %v1248_v35 = vmul.f32 %v3259_v47, %v3838_v36  ;;  %v3419_v20 = vadd.f32 %v1011_v9, %v939_v41  ;;  %1273 = vadd.xlane.f32.xlu1 %v1272_v1  ;;  %v1279_v9 = vadd.f32 %v1250_v5, %v1249_v56  ;;  %v921_v56 = vadd.f32 %v3208_v30, %v3192_v15 }
 0x236   :  { %v3421_v32 = vpop.f32.mrf.mxu0  ;;  %v1283_v29 = vadd.f32 %v1253_v11, %v1252_v48 }
 0x237   :  { %3879 = vst [vmem:[#allocation13_spill] sm:$0xff] %v3419_v20  ;;  %v3841_v60 = vmax.f32 %v3419_v20, 0.0  ;;  %v1276_v14 = vadd.f32 %v1275_v21, %v1248_v35  ;;  %v3443_v20 = vpop.f32.mrf.mxu1  ;;  %v3452_v11 = vadd.f32 %v3324_v57, %v921_v56  ;;  %v911_v57 = vadd.f32 %v3190_v43, %v3206_v4 }
 0x238   :  { %v1015_v23 = vpop.f32.mrf.mxu0  ;;  %v915_v56 = vadd.f32 %v3198_v51, %v3196_v49 }
 0x239   :  { %v1251_v41 = vmul.f32 %v3259_v47, %v3841_v60  ;;  %v3434_v1 = vadd.f32 %v1015_v23, %v943_v18  ;;  %1277 = vadd.xlane.f32.xlu1 %v1276_v14  ;;  %3881 = vst [vmem:[#allocation15_spill] sm:$0xff] %v3452_v11  ;;  %v3884_v51 = vmax.f32 %v3452_v11, 0.0 }
 0x23a   :  { %v3445_v14 = vpop.f32.mrf.mxu0  ;;  %v3477_v43 = vadd.f32 %v3296_v24, %v915_v56  ;;  %v3495_v56 = vadd.f32 %v3262_v42, %v911_v57 }
 0x23b   :  { %3880 = vst [vmem:[#allocation14_spill] sm:$0xff] %v3434_v1  ;;  %v3843_v36 = vmax.f32 %v3434_v1, 0.0  ;;  %v1280_v35 = vadd.f32 %v1279_v9, %v1251_v41 }
 0x23c   :  { %v3854_v42 = vmax.f32 %v3477_v43, 0.0 }
 0x23d   :  { %v1254_v21 = vmul.f32 %v3259_v47, %v3843_v36  ;;  %1281 = vadd.xlane.f32.xlu1 %v1280_v35  ;;  %v925_v36 = vadd.f32 %v3229_v46, %v3202_v0 }
 0x23f   :  { %v1284_v60 = vadd.f32 %v1283_v29, %v1254_v21  ;;  %v3457_v30 = vadd.f32 %v3354_v19, %v925_v36 }
 0x241   :  { %v1054_v18 = vpop.f32.mrf.mxu1  ;;  %1285 = vadd.xlane.f32.xlu0 %v1284_v60  ;;  %v3885_v57 = vmax.f32 %v3457_v30, 0.0 }
 0x243   :  { %v1056_v5 = vpop.f32.mrf.mxu1 }
 0x245   :  { %v1058_v23 = vpop.f32.mrf.mxu1  ;;  %v1127_v52 = vpop.f32.mrf.mxu0 }
 0x246   :  { %v1059_v37 = vadd.f32 %v1058_v23, %v3196_v49  ;;  %v1055_v23 = vadd.f32 %v1054_v18, %v3206_v4 }
 0x247   :  { %v1060_v41 = vpop.f32.mrf.mxu1  ;;  %v1129_v9 = vpop.f32.mrf.mxu0 }
 0x249   :  { %v1064_v48 = vpop.f32.mrf.mxu1  ;;  %v1131_v29 = vpop.f32.mrf.mxu0 }
 0x24a   :  { %v1065_v21 = vadd.f32 %v1064_v48, %v3192_v15  ;;  %v941_v48 = vadd.f32 %v3386_v61, %v3216_v25  ;;  %v3469_v53 = vadd.f32 %v1131_v29, %v1059_v37  ;;  %v1061_v61 = vadd.f32 %v1060_v41, %v3196_v49 }
 0x24b   :  { %v1066_v35 = vpop.f32.mrf.mxu1  ;;  %v1133_v60 = vpop.f32.mrf.mxu0 }
 0x24c   :  { %v1067_v46 = vadd.f32 %v1066_v35, %v3192_v15  ;;  %v1683_v35 = vmul.f32 %v3239_v28, %v3884_v51  ;;  %v3498_v51 = vadd.f32 %v1133_v60, %v1061_v61  ;;  %v1686_v60 = vmul.f32 %v3239_v28, %v3885_v57 }
 0x24d   :  { %v1068_v63 = vpop.f32.mrf.mxu1  ;;  %v1137_v33 = vpop.f32.mrf.mxu0 }
 0x24e   :  { %v3461_v1 = vadd.f32 %v1137_v33, %v1065_v21  ;;  %v1069_v27 = vadd.f32 %v1068_v63, %v3202_v0  ;;  %v3486_v21 = vadd.f32 %v1127_v52, %v1055_v23  ;;  %v1057_v23 = vadd.f32 %v1056_v5, %v3206_v4 }
 0x24f   :  { %v1070_v19 = vpop.f32.mrf.mxu1  ;;  %v1139_v36 = vpop.f32.mrf.mxu0 }
 0x250   :  { %3882 = vst [vmem:[#allocation16_spill] sm:$0xff] %v3461_v1  ;;  %v3850_v15 = vmax.f32 %v3461_v1, 0.0  ;;  %v3474_v33 = vadd.f32 %v1139_v36, %v1067_v46  ;;  %v3853_v36 = vmax.f32 %v3469_v53, 0.0  ;;  %v1071_v49 = vadd.f32 %v1070_v19, %v3202_v0 }
 0x251   :  { %v3484_v29 = vpop.f32.mrf.mxu1  ;;  %v1141_v18 = vpop.f32.mrf.mxu0  ;;  %v3515_v4 = vadd.f32 %v1129_v9, %v1057_v23  ;;  %v3534_v23 = vadd.f32 %v3421_v32, %v941_v48  ;;  %v3888_v32 = vmax.f32 %v3486_v21, 0.0 }
 0x252   :  { %3883 = vst [vmem:[#allocation17_spill] sm:$0xff] %v3474_v33  ;;  %v1684_v63 = vmul.f32 %v3232_v16, %v3850_v15  ;;  %v3851_v24 = vmax.f32 %v3474_v33, 0.0  ;;  %v3492_v46 = vadd.f32 %v1141_v18, %v1069_v27 }
 0x253   :  { %v3501_v41 = vpop.f32.mrf.mxu1  ;;  %v1143_v52 = vpop.f32.mrf.mxu0  ;;  %3887 = vst [vmem:[#allocation19_spill] sm:$0xff] %v3534_v23  ;;  %v1678_v48 = vmul.f32 %v3232_v16, %v3888_v32 }
 0x254   :  { %v1709_v37 = vadd.f32 %v1684_v63, %v1683_v35  ;;  %v1685_v27 = vmul.f32 %v3259_v47, %v3851_v24  ;;  %v3852_v18 = vmax.f32 %v3492_v46, 0.0  ;;  %v3512_v61 = vadd.f32 %v1143_v52, %v1071_v49  ;;  %v1295_v63 = vld [vmem:[%s3815_s4] sm:$0xff] }
 0x255   :  { %v1078_v0 = vpop.f32.mrf.mxu1  ;;  %v1147_v19 = vpop.f32.mrf.mxu0  ;;  %v1681_v49 = vmul.f32 %v3232_v16, %v3853_v36  ;;  %2261 = vmatprep.mubr.msk.f32.mxu0 %vm715_vm2, %v1295_v63  ;;  %2295 = vmatprep.mubr.msk.f32.mxu1 %vm715_vm2, %v1295_v63  ;;  %v935_v63 = vadd.f32 %v3330_v26, %v3237_v58  ;;  %v3890_v26 = vmax.f32 %v3495_v56, 0.0 }
 0x256   :  { %3886 = vst [vmem:[#allocation18_spill] sm:$0xff] %v3512_v61  ;;  %v1687_v5 = vmul.f32 %v3232_v16, %v3852_v18  ;;  %v1710_v35 = vadd.f32 %v1709_v37, %v1685_v27  ;;  %v3855_v57 = vmax.f32 %v3512_v61, 0.0  ;;  %v1680_v18 = vmul.f32 %v3239_v28, %v3854_v42 }
 0x257   :  { %v1080_v24 = vpop.f32.mrf.mxu1  ;;  %v3528_v9 = vpop.f32.mrf.mxu0  ;;  %v945_v37 = vadd.f32 %v3443_v20, %v3188_v38  ;;  %v1677_v20 = vmul.f32 %v3239_v28, %v3890_v26 }
 0x258   :  { %v1713_v27 = vadd.f32 %v1687_v5, %v1686_v60  ;;  %1711 = vadd.xlane.f32.xlu0 %v1710_v35  ;;  %v1688_v36 = vmul.f32 %v3259_v47, %v3855_v57  ;;  %v1705_v5 = vadd.f32 %v1681_v49, %v1680_v18  ;;  %v3889_v35 = vmax.f32 %v3498_v51, 0.0 }
 0x259   :  { %v1084_v52 = vpop.f32.mrf.mxu1  ;;  %v1151_v15 = vpop.f32.mrf.mxu0  ;;  %v1079_v57 = vadd.f32 %v1078_v0, %v3237_v58  ;;  %v931_v18 = vadd.f32 %v3275_v62, %v3272_v59  ;;  %v3562_v49 = vadd.f32 %v3445_v14, %v945_v37  ;;  %v1075_v14 = vadd.f32 %v3484_v29, %v3272_v59 }
 0x25a   :  { %v1682_v42 = vmul.f32 %v3259_v47, %v3889_v35  ;;  %v1714_v11 = vadd.f32 %v1713_v27, %v1688_v36  ;;  %v1085_v32 = vadd.f32 %v1084_v52, %v3216_v25  ;;  %v3567_v36 = vadd.f32 %v3404_v22, %v935_v63 }
 0x25b   :  { %v1086_v33 = vpop.f32.mrf.mxu1  ;;  %v1153_v1 = vpop.f32.mrf.mxu0  ;;  %v3564_v35 = vadd.f32 %v1151_v15, %v1079_v57  ;;  %v1701_v27 = vadd.f32 %v1678_v48, %v1677_v20  ;;  %v3892_v52 = vmax.f32 %v3515_v4, 0.0  ;;  %v1081_v15 = vadd.f32 %v1080_v24, %v3237_v58 }
 0x25c   :  { %1715 = vadd.xlane.f32.xlu0 %v1714_v11  ;;  %v1087_v26 = vadd.f32 %v1086_v33, %v3216_v25  ;;  %v1706_v37 = vadd.f32 %v1705_v5, %v1682_v42  ;;  %v3893_v22 = vmax.f32 %v3534_v23, 0.0  ;;  %v3586_v20 = vadd.f32 %v1147_v19, %v1075_v14 }
 0x25d   :  { %v1088_v0 = vpop.f32.mrf.mxu1  ;;  %v1157_v60 = vpop.f32.mrf.mxu0  ;;  %v1679_v62 = vmul.f32 %v3259_v47, %v3892_v52  ;;  %v3869_v29 = vmax.f32 %v3564_v35, 0.0  ;;  %v3589_v58 = vadd.f32 %v1153_v1, %v1081_v15  ;;  %v3870_v19 = vmax.f32 %v3567_v36, 0.0 }
 0x25e   :  { %v3570_v61 = vadd.f32 %v1157_v60, %v1085_v32  ;;  %v1695_v63 = vmul.f32 %v3239_v28, %v3893_v22  ;;  %v1089_v25 = vadd.f32 %v1088_v0, %v3188_v38  ;;  %v3864_v60 = vmax.f32 %v3562_v49, 0.0 }
 0x25f   :  { %v1090_v11 = vpop.f32.mrf.mxu1  ;;  %v1159_v57 = vpop.f32.mrf.mxu0  ;;  %v1077_v1 = vadd.f32 %v3501_v41, %v3272_v59  ;;  %v1702_v14 = vadd.f32 %v1701_v27, %v1679_v62  ;;  %v1693_v59 = vmul.f32 %v3232_v16, %v3869_v29  ;;  %v3868_v41 = vmax.f32 %v3589_v58, 0.0 }
 0x260   :  { %3891 = vst [vmem:[#allocation20_spill] sm:$0xff] %v3570_v61  ;;  %v3861_v33 = vmax.f32 %v3570_v61, 0.0  ;;  %v3583_v48 = vadd.f32 %v1159_v57, %v1087_v26  ;;  %1707 = vadd.xlane.f32.xlu0 %v1706_v37  ;;  %v1091_v5 = vadd.f32 %v1090_v11, %v3188_v38  ;;  %v3599_v26 = vadd.f32 %v3378_v3, %v931_v18 }
 0x261   :  { %v1161_v24 = vpop.f32.mrf.mxu0  ;;  %v1698_v3 = vmul.f32 %v3239_v28, %v3864_v60  ;;  %v3866_v18 = vmax.f32 %v3586_v20, 0.0  ;;  %v3615_v37 = vadd.f32 %v3528_v9, %v1077_v1  ;;  %v1692_v9 = vmul.f32 %v3239_v28, %v3870_v19 }
 0x262   :  { %3894 = vst [vmem:[#allocation21_spill] sm:$0xff] %v3583_v48  ;;  %v1696_v42 = vmul.f32 %v3232_v16, %v3861_v33  ;;  %v3860_v32 = vmax.f32 %v3583_v48, 0.0  ;;  %v3596_v0 = vadd.f32 %v1161_v24, %v1089_v25 }
 0x263   :  { %v1163_v52 = vpop.f32.mrf.mxu0  ;;  %v1721_v1 = vadd.f32 %v1693_v59, %v1692_v9 }
 0x264   :  { %v1725_v15 = vadd.f32 %v1696_v42, %v1695_v63  ;;  %v1697_v57 = vmul.f32 %v3259_v47, %v3860_v32  ;;  %v3863_v38 = vmax.f32 %v3596_v0, 0.0  ;;  %v3608_v11 = vadd.f32 %v1163_v52, %v1091_v5  ;;  %1703 = vadd.xlane.f32.xlu0 %v1702_v14 }
 0x265   :  { %v3867_v63 = vmax.f32 %v3599_v26, 0.0  ;;  %v1690_v42 = vmul.f32 %v3232_v16, %v3866_v18  ;;  %v3865_v5 = vmax.f32 %v3615_v37, 0.0  ;;  %v1694_v52 = vmul.f32 %v3259_v47, %v3868_v41 }
 0x266   :  { %v1699_v27 = vmul.f32 %v3232_v16, %v3863_v38  ;;  %v3862_v62 = vmax.f32 %v3608_v11, 0.0  ;;  %v1726_v22 = vadd.f32 %v1725_v15, %v1697_v57 }
 0x267   :  { %v1689_v15 = vmul.f32 %v3239_v28, %v3867_v63 }
 0x268   :  { %v1729_v25 = vadd.f32 %v1699_v27, %v1698_v3  ;;  %v1700_v24 = vmul.f32 %v3259_v47, %v3862_v62  ;;  %1727 = vadd.xlane.f32.xlu1 %v1726_v22  ;;  %v1691_v3 = vmul.f32 %v3259_v47, %v3865_v5  ;;  %v1722_v27 = vadd.f32 %v1721_v1, %v1694_v52  ;;  %v1296_v52 = vld [vmem:[%s3815_s4 + $0x8] sm:$0xff] }
 0x269   :  { %v1717_v57 = vadd.f32 %v1690_v42, %v1689_v15 }
 0x26a   :  { %v1730_v14 = vadd.f32 %v1729_v25, %v1700_v24 }
 0x26b   :  { %v1718_v16 = vadd.f32 %v1717_v57, %v1691_v3 }
 0x26c   :  { %1731 = vadd.xlane.f32.xlu1 %v1730_v14 }
 0x270   :  { %1723 = vadd.xlane.f32.xlu1 %v1722_v27 }
 0x274   :  { %1719 = vadd.xlane.f32.xlu1 %v1718_v16 }
 0x2ae   :  { %v1258_v59 = vpop.xlane.xlu0 %1257 }
 0x2b2   :  { %v1262_v32 = vpop.xlane.xlu0 %1261 }
 0x2b6   :  { %v1266_v25 = vpop.xlane.xlu0 %1265 }
 0x2ba   :  { %v1270_v22 = vpop.xlane.xlu1 %1269 }
 0x2be   :  { %v1274_v9 = vpop.xlane.xlu1 %1273 }
 0x2bf   :  { %v1287_v15 = vadd.f32 %v1274_v9, %v1258_v59 }
 0x2c1   :  { %v1291_v1 = vmul.f32 0.00390625, %v1287_v15 }
 0x2c2   :  { %v1278_v33 = vpop.xlane.xlu1 %1277 }
 0x2c3   :  { %v1288_v14 = vadd.f32 %v1278_v33, %v1262_v32  ;;  %v1297_v33 = vld [vmem:[%s3815_s4 + $0x10] sm:$0xff] }
 0x2c5   :  { %v1292_v47 = vmul.f32 0.00390625, %v1288_v14 }
 0x2c6   :  { %v1282_v24 = vpop.xlane.xlu1 %1281 }
 0x2c7   :  { %v1289_v38 = vadd.f32 %v1282_v24, %v1266_v25 }
 0x2c9   :  { %v1293_v60 = vmul.f32 0.00390625, %v1289_v38 }
 0x2ca   :  { %v1286_v62 = vpop.xlane.xlu0 %1285 }
 0x2cb   :  { %v1290_v28 = vadd.f32 %v1286_v62, %v1270_v22 }
 0x2cd   :  { %v1294_v42 = vmul.f32 0.00390625, %v1290_v28 }
 0x2cf   :  { %2253 = vmatprep.subr.mxu0 %v1294_v42 }
 0x2d0   :  { %2254 = vmatpush3.msra.mxu0 %v1294_v42 }
 0x2d1   :  { %2255 = vmatprep.subr.mxu0 %v1293_v60 }
 0x2d2   :  { %2256 = vmatpush3.msra.mxu0 %v1293_v60  ;;  %v1298_v60 = vld [vmem:[%s3815_s4 + $0x18] sm:$0xff] }
 0x2d3   :  { %2257 = vmatprep.subr.mxu0 %v1292_v47 }
 0x2d4   :  { %2258 = vmatpush3.msra.mxu0 %v1292_v47  ;;  %v1404_v47 = vld [vmem:[%s3817_s6] sm:$0xff] }
 0x2d5   :  { %2259 = vmatprep.subr.mxu0 %v1291_v1 }
 0x2d6   :  { %2260 = vmatpush3.msra.mxu0 %v1291_v1  ;;  %v1406_v1 = vld [vmem:[%s3817_s6 + $0x10] sm:$0xff] }
 0x2d7   :  { %2262 = vmatmul.mubr.msk.f32.vlgmr.msra.gmra.mxu0 %vm715_vm2, %v1296_v52 }
 0x2d8   :  { %2264 = vmatprep.mubr.msk.f32.mxu0 %vm715_vm2, %v1297_v33 }
 0x2db   :  { %2265 = vmatmul.mubr.msk.f32.gmra.mxu0 %vm715_vm2, %v1298_v60 }
 0x2dc   :  { %2275 = vmatprep.mubr.msk.f32.mxu0 %vm715_vm2, %v1404_v47 }
 0x2e1   :  { %v1712_v32 = vpop.xlane.xlu0 %1711 }
 0x2e5   :  { %v1716_v38 = vpop.xlane.xlu0 %1715 }
 0x2e9   :  { %v1708_v16 = vpop.xlane.xlu0 %1707 }
 0x2ed   :  { %v1704_v28 = vpop.xlane.xlu0 %1703 }
 0x2f1   :  { %v1728_v62 = vpop.xlane.xlu1 %1727 }
 0x2f2   :  { %v1735_v3 = vadd.f32 %v1728_v62, %v1712_v32 }
 0x2f4   :  { %v1739_v9 = vmul.f32 0.00390625, %v1735_v3 }
 0x2f5   :  { %v1732_v57 = vpop.xlane.xlu1 %1731 }
 0x2f6   :  { %v1736_v27 = vadd.f32 %v1732_v57, %v1716_v38  ;;  %v1299_v38 = vld [vmem:[%s3816_s5] sm:$0xff]  ;;  %v1301_v57 = vld [vmem:[%s3816_s5 + $0x10] sm:$0xff] }
 0x2f8   :  { %v1740_v59 = vmul.f32 0.00390625, %v1736_v27 }
 0x2f9   :  { %v1724_v22 = vpop.xlane.xlu1 %1723 }
 0x2fa   :  { %v1734_v25 = vadd.f32 %v1724_v22, %v1708_v16  ;;  %2287 = vmatprep.subr.mxu1 %v1740_v59 }
 0x2fb   :  { %2288 = vmatpush3.msra.mxu1 %v1740_v59 }
 0x2fc   :  { %v1738_v24 = vmul.f32 0.00390625, %v1734_v25  ;;  %2289 = vmatprep.subr.mxu1 %v1739_v9 }
 0x2fd   :  { %2290 = vmatpush3.msra.mxu1 %v1739_v9  ;;  %v1720_v14 = vpop.xlane.xlu1 %1719 }
 0x2fe   :  { %v1733_v42 = vadd.f32 %v1720_v14, %v1704_v28  ;;  %2291 = vmatprep.subr.mxu1 %v1738_v24  ;;  %v1405_v14 = vld [vmem:[%s3817_s6 + $0x8] sm:$0xff] }
 0x2ff   :  { %2292 = vmatpush3.msra.mxu1 %v1738_v24 }
 0x300   :  { %v1737_v15 = vmul.f32 0.00390625, %v1733_v42  ;;  %v1407_v42 = vld [vmem:[%s3817_s6 + $0x18] sm:$0xff] }
 0x302   :  { %2293 = vmatprep.subr.mxu1 %v1737_v15 }
 0x303   :  { %2294 = vmatpush3.msra.mxu1 %v1737_v15  ;;  %v1408_v15 = vld [vmem:[%s3817_s6 + $0x20] sm:$0xff] }
 0x304   :  { %2296 = vmatmul.mubr.msk.f32.vlgmr.msra.gmra.mxu1 %vm715_vm2, %v1296_v52  ;;  %v1300_v52 = vld [vmem:[%s3816_s5 + $0x8] sm:$0xff] }
 0x305   :  { %2298 = vmatprep.mubr.msk.f32.mxu1 %vm715_vm2, %v1297_v33 }
 0x308   :  { %2299 = vmatmul.mubr.msk.f32.gmra.mxu1 %vm715_vm2, %v1298_v60  ;;  %v1302_v60 = vld [vmem:[%s3816_s5 + $0x18] sm:$0xff] }
 0x309   :  { %2312 = vmatprep.mubr.msk.f32.mxu1 %vm715_vm2, %v1406_v1 }
 0x397   :  { %v2263_v32 = vpop.f32.mrf.mxu0 }
 0x398   :  { %v1387_v3 = vadd.f32 %v2263_v32, %v1300_v52  ;;  %v1409_v32 = vld [vmem:[%s3817_s6 + $0x28] sm:$0xff] }
 0x399   :  { %v1381_v33 = vpop.f32.mrf.mxu0 }
 0x39a   :  { %v1382_v59 = vadd.f32 %v1381_v33, %v1299_v38  ;;  %v1401_v25 = vmax.f32 %v1387_v3, 0.0  ;;  %v1411_v33 = vld [vmem:[%s3817_s6 + $0x38] sm:$0xff] }
 0x39b   :  { %v2266_v62 = vpop.f32.mrf.mxu0 }
 0x39c   :  { %v1397_v27 = vadd.f32 %v2266_v62, %v1302_v60  ;;  %v1400_v28 = vmax.f32 %v1382_v59, 0.0 }
 0x39d   :  { %v1391_v16 = vpop.f32.mrf.mxu0 }
 0x39e   :  { %v1403_v22 = vmax.f32 %v1397_v27, 0.0  ;;  %v1392_v9 = vadd.f32 %v1391_v16, %v1301_v57 }
 0x3a0   :  { %v1402_v24 = vmax.f32 %v1392_v9, 0.0  ;;  %2267 = vmatprep.subr.mxu0 %v1403_v22 }
 0x3a1   :  { %2268 = vmatpush3.msra.mxu0 %v1403_v22 }
 0x3a2   :  { %2269 = vmatprep.subr.mxu0 %v1402_v24 }
 0x3a3   :  { %2270 = vmatpush3.msra.mxu0 %v1402_v24 }
 0x3a4   :  { %2271 = vmatprep.subr.mxu0 %v1401_v25 }
 0x3a5   :  { %2272 = vmatpush3.msra.mxu0 %v1401_v25 }
 0x3a6   :  { %2273 = vmatprep.subr.mxu0 %v1400_v28 }
 0x3a7   :  { %2274 = vmatpush3.msra.mxu0 %v1400_v28 }
 0x3a8   :  { %2276 = vmatmul.mubr.msk.f32.vlgmr.msra.gmra.mxu0 %vm715_vm2, %v1405_v14 }
 0x3a9   :  { %2278 = vmatprep.mubr.msk.f32.mxu0 %vm715_vm2, %v1406_v1  ;;  %v1410_v1 = vld [vmem:[%s3817_s6 + $0x30] sm:$0xff]  ;;  %s2490_s6 = smov [#allocation5]  }
 0x3aa   :  { %s2129_s18 = sshll.u32 %s2490_s6, 4  ;;  %s2130_s18 = int_to_ptr.vmem [resolvable:$true] %s2129_s18 }
 0x3ab   :  { %s2454_s19 = scalar_lea.vmem %s2130_s18, 3072  ;;  %p2459_p6 = scmp.lt.s32.totalorder %s2130_s18, %s2130_s18 }
 0x3ac   :  { %2279 = vmatmul.mubr.msk.f32.gmra.mxu0 %vm715_vm2, %v1407_v42  ;;  %p2455_p5 = scmp.ne.s32.totalorder %s2130_s18, %s2454_s19  ;;  %p2460_p7 = scmp.lt.s32.totalorder %s2454_s19, %s2454_s19 }
 0x3ad   :  { %2281 = vmatprep.mubr.msk.f32.mxu0 %vm715_vm2, %v1408_v15 }
 0x3ae   :  { %p2461_p8 = por %p2460_p7, %p2459_p6 }
 0x3b0   :  { %2282 = vmatmul.mubr.msk.f32.gmra.mxu0 %vm715_vm2, %v1409_v32  ;;  %p2462_p9 = pnand %p2461_p8, %p2455_p5 }
 0x3b1   :  { %2284 = vmatprep.mubr.msk.f32.mxu0 %vm715_vm2, %v1410_v1 }
 0x3b4   :  { %2285 = vmatmul.mubr.msk.f32.gmra.mxu0 %vm715_vm2, %v1411_v33 }
 0x3b5   :  { %2309 = vmatprep.mubr.msk.f32.mxu0 %vm715_vm2, %v1404_v47 }
 0x3c4   :  { %v2297_v62 = vpop.f32.mrf.mxu1 }
 0x3c5   :  { %v1833_v22 = vadd.f32 %v2297_v62, %v1300_v52 }
 0x3c6   :  { %v1827_v3 = vpop.f32.mrf.mxu1 }
 0x3c7   :  { %v1828_v24 = vadd.f32 %v1827_v3, %v1299_v38  ;;  %v1847_v5 = vmax.f32 %v1833_v22, 0.0 }
 0x3c8   :  { %v2300_v27 = vpop.f32.mrf.mxu1 }
 0x3c9   :  { %v1843_v16 = vadd.f32 %v2300_v27, %v1302_v60  ;;  %v1846_v47 = vmax.f32 %v1828_v24, 0.0 }
 0x3ca   :  { %v1837_v59 = vpop.f32.mrf.mxu1 }
 0x3cb   :  { %v1849_v9 = vmax.f32 %v1843_v16, 0.0  ;;  %v1838_v25 = vadd.f32 %v1837_v59, %v1301_v57 }
 0x3cd   :  { %v1848_v28 = vmax.f32 %v1838_v25, 0.0  ;;  %2321 = vmatprep.subr.mxu1 %v1849_v9  ;;  %2301 = vmatprep.subr.mxu0 %v1849_v9 }
 0x3ce   :  { %2325 = vmatpush3.msra.mxu1 %v1849_v9  ;;  %2302 = vmatpush3.msra.mxu0 %v1849_v9 }
 0x3cf   :  { %2322 = vmatprep.subr.mxu1 %v1848_v28  ;;  %2303 = vmatprep.subr.mxu0 %v1848_v28 }
 0x3d0   :  { %2326 = vmatpush3.msra.mxu1 %v1848_v28  ;;  %2304 = vmatpush3.msra.mxu0 %v1848_v28 }
 0x3d1   :  { %2323 = vmatprep.subr.mxu1 %v1847_v5  ;;  %2305 = vmatprep.subr.mxu0 %v1847_v5 }
 0x3d2   :  { %2327 = vmatpush3.msra.mxu1 %v1847_v5  ;;  %2306 = vmatpush3.msra.mxu0 %v1847_v5 }
 0x3d3   :  { %2324 = vmatprep.subr.mxu1 %v1846_v47  ;;  %2307 = vmatprep.subr.mxu0 %v1846_v47 }
 0x3d4   :  { %2328 = vmatpush3.msra.mxu1 %v1846_v47  ;;  %2308 = vmatpush3.msra.mxu0 %v1846_v47 }
 0x3d5   :  { %2313 = vmatmul.mubr.msk.f32.vlgmr.msra.gmra.mxu1 %vm715_vm2, %v1407_v42  ;;  %2310 = vmatmul.mubr.msk.f32.vlgmr.msra.gmra.mxu0 %vm715_vm2, %v1405_v14 }
 0x3d6   :  { %2315 = vmatprep.mubr.msk.f32.mxu1 %vm715_vm2, %v1408_v15 }
 0x3d9   :  { %2316 = vmatmul.mubr.msk.f32.gmra.mxu1 %vm715_vm2, %v1409_v32 }
 0x3da   :  { %2318 = vmatprep.mubr.msk.f32.mxu1 %vm715_vm2, %v1410_v1 }
 0x3dd   :  { %2319 = vmatmul.mubr.msk.f32.gmra.mxu1 %vm715_vm2, %v1411_v33 }
 0x468   :  { %v2277_v52 = vpop.f32.mrf.mxu0 }
 0x46a   :  { %v1502_v60 = vpop.f32.mrf.mxu0 }
 0x46c   :  { %v2280_v38 = vpop.f32.mrf.mxu0 }
 0x46e   :  { %v1512_v5 = vpop.f32.mrf.mxu0 }
 0x470   :  { %v2283_v57 = vpop.f32.mrf.mxu0 }
 0x471   :  { %v1542_v62 = vmax.f32 %v2277_v52, %v2283_v57 }
 0x472   :  { %v1522_v3 = vpop.f32.mrf.mxu0 }
 0x473   :  { %v1546_v27 = vsub.f32 %v2277_v52, %v1542_v62  ;;  %v1558_v16 = vsub.f32 %v2283_v57, %v1542_v62  ;;  %v1541_v42 = vmax.f32 %v1502_v60, %v1522_v3 }
 0x474   :  { %v2286_v59 = vpop.f32.mrf.mxu0 }
 0x475   :  { %v1551_v14 = vmul.f32 1.442695, %v1546_v27  ;;  %v1563_v22 = vmul.f32 1.442695, %v1558_v16  ;;  %v1545_v15 = vsub.f32 %v1502_v60, %v1541_v42  ;;  %v1557_v9 = vsub.f32 %v1522_v3, %v1541_v42 }
 0x476   :  { %v1544_v32 = vmax.f32 %v2280_v38, %v2286_v59  ;;  %v1532_v25 = vpop.f32.mrf.mxu0 }
 0x477   :  { %2386 = vpow2.f32 %v1551_v14  ;;  %v1549_v1 = vmul.f32 1.442695, %v1545_v15  ;;  %v1561_v33 = vmul.f32 1.442695, %v1557_v9  ;;  %v1543_v24 = vmax.f32 %v1512_v5, %v1532_v25 }
 0x478   :  { %2388 = vpow2.f32 %v1563_v22  ;;  %v1548_v28 = vsub.f32 %v2280_v38, %v1544_v32  ;;  %v1560_v47 = vsub.f32 %v2286_v59, %v1544_v32 }
 0x479   :  { %2390 = vpow2.f32 %v1549_v1  ;;  %v1547_v18 = vsub.f32 %v1512_v5, %v1543_v24  ;;  %v1559_v63 = vsub.f32 %v1532_v25, %v1543_v24 }
 0x47a   :  { %2392 = vpow2.f32 %v1561_v33  ;;  %v1555_v52 = vmul.f32 1.442695, %v1548_v28  ;;  %v1567_v57 = vmul.f32 1.442695, %v1560_v47 }
 0x47b   :  { %v1553_v62 = vmul.f32 1.442695, %v1547_v18  ;;  %v1565_v27 = vmul.f32 1.442695, %v1559_v63 }
 0x47c   :  { %2394 = vpow2.f32 %v1555_v52 }
 0x47d   :  { %2396 = vpow2.f32 %v1567_v57 }
 0x47e   :  { %2398 = vpow2.f32 %v1553_v62 }
 0x47f   :  { %2400 = vpow2.f32 %v1565_v27 }
 0x484   :  { %v2387_v60 = vpop.eup %2386 }
 0x485   :  { %v2389_v3 = vpop.eup %2388 }
 0x486   :  { %v2391_v16 = vpop.eup %2390  ;;  %v1570_v42 = vadd.f32 %v2389_v3, %v2387_v60 }
 0x487   :  { %v2393_v14 = vpop.eup %2392 }
 0x488   :  { %2402 = vrcp.f32 %v1570_v42  ;;  %v1569_v38 = vadd.f32 %v2393_v14, %v2391_v16 }
 0x489   :  { %v2395_v59 = vpop.eup %2394 }
 0x48a   :  { %v2397_v22 = vpop.eup %2396  ;;  %2404 = vrcp.f32 %v1569_v38 }
 0x48b   :  { %v2399_v5 = vpop.eup %2398  ;;  %v1572_v15 = vadd.f32 %v2397_v22, %v2395_v59 }
 0x48c   :  { %v2401_v9 = vpop.eup %2400 }
 0x48d   :  { %2406 = vrcp.f32 %v1572_v15  ;;  %v1571_v18 = vadd.f32 %v2401_v9, %v2399_v5 }
 0x48f   :  { %2408 = vrcp.f32 %v1571_v18 }
 0x495   :  { %v2403_v63 = vpop.eup %2402  ;;  %v2314_v32 = vpop.f32.mrf.mxu1 }
 0x496   :  { %v1618_v25 = vmul.f32 %v2403_v63, %v2389_v3  ;;  %v1582_v1 = vmul.f32 %v2403_v63, %v2387_v60  ;;  %v2311_v28 = vpop.f32.mrf.mxu0 }
 0x497   :  { %v2405_v33 = vpop.eup %2404  ;;  %v1958_v24 = vpop.f32.mrf.mxu1 }
 0x498   :  { %1628 = vperm.xlu0 %2344, %v1618_v25   ;;  %1592 = vperm.xlu1 %2345, %v1582_v1   ;;  %v1617_v62 = vmul.f32 %v2405_v33, %v2393_v14  ;;  %v1581_v27 = vmul.f32 %v2405_v33, %v2391_v16  ;;  %v1948_v42 = vpop.f32.mrf.mxu0 }
 0x499   :  { %v2317_v47 = vpop.f32.mrf.mxu1 }
 0x49a   :  { %v2407_v52 = vpop.eup %2406  ;;  %v1988_v57 = vmax.f32 %v2311_v28, %v2317_v47 }
 0x49b   :  { %v1968_v38 = vpop.f32.mrf.mxu1  ;;  %v1584_v60 = vmul.f32 %v2407_v52, %v2395_v59 }
 0x49c   :  { %v2409_v41 = vpop.eup %2408  ;;  %v1992_v15 = vsub.f32 %v2311_v28, %v1988_v57  ;;  %v2004_v29 = vsub.f32 %v2317_v47, %v1988_v57  ;;  %v1987_v18 = vmax.f32 %v1948_v42, %v1968_v38  ;;  %1623 = vperm.xlu1 %2345, %v1617_v62   ;;  %1587 = vperm.xlu0 %2344, %v1581_v27  }
 0x49d   :  { %v2320_v3 = vpop.f32.mrf.mxu1  ;;  %v1583_v63 = vmul.f32 %v2409_v41, %v2399_v5  ;;  %v1620_v57 = vmul.f32 %v2407_v52, %v2397_v22  ;;  %v1619_v5 = vmul.f32 %v2409_v41, %v2401_v9 }
 0x49e   :  { %v1997_v19 = vmul.f32 1.442695, %v1992_v15  ;;  %v2009_v48 = vmul.f32 1.442695, %v2004_v29  ;;  %v1991_v25 = vsub.f32 %v1948_v42, %v1987_v18  ;;  %v2003_v1 = vsub.f32 %v1968_v38, %v1987_v18 }
 0x49f   :  { %v1990_v61 = vmax.f32 %v2314_v32, %v2320_v3  ;;  %v1978_v23 = vpop.f32.mrf.mxu1 }
 0x4a0   :  { %2410 = vpow2.f32 %v1997_v19  ;;  %v1995_v14 = vmul.f32 1.442695, %v1991_v25  ;;  %v2007_v16 = vmul.f32 1.442695, %v2003_v1  ;;  %v1989_v33 = vmax.f32 %v1958_v24, %v1978_v23  ;;  %1602 = vperm.xlu0 %2344, %v1584_v60   ;;  %1597 = vperm.xlu1 %2345, %v1583_v63  }
 0x4a1   :  { %2412 = vpow2.f32 %v2009_v48  ;;  %v1994_v28 = vsub.f32 %v2314_v32, %v1990_v61  ;;  %v2006_v47 = vsub.f32 %v2320_v3, %v1990_v61 }
 0x4a2   :  { %2414 = vpow2.f32 %v1995_v14  ;;  %v1993_v62 = vsub.f32 %v1958_v24, %v1989_v33  ;;  %v2005_v59 = vsub.f32 %v1978_v23, %v1989_v33 }
 0x4a3   :  { %2416 = vpow2.f32 %v2007_v16  ;;  %v2001_v29 = vmul.f32 1.442695, %v1994_v28  ;;  %v2013_v27 = vmul.f32 1.442695, %v2006_v47 }
 0x4a4   :  { %v1999_v42 = vmul.f32 1.442695, %v1993_v62  ;;  %v2011_v38 = vmul.f32 1.442695, %v2005_v59  ;;  %1638 = vperm.xlu0 %2344, %v1620_v57   ;;  %1633 = vperm.xlu1 %2345, %v1619_v5  }
 0x4a5   :  { %2418 = vpow2.f32 %v2001_v29  ;;  %v3895_v29 = vmax.f32 %v3352_v40, 0.0 }
 0x4a6   :  { %2420 = vpow2.f32 %v2013_v27 }
 0x4a7   :  { %2422 = vpow2.f32 %v1999_v42  ;;  %v3896_v42 = vmax.f32 %v3337_v2, 0.0  ;;  %v3901_v2 = vmax.f32 %v3223_v7, 0.0 }
 0x4a8   :  { %2424 = vpow2.f32 %v2011_v38 }
 0x4ad   :  { %v2411_v19 = vpop.eup %2410 }
 0x4ae   :  { %v2413_v48 = vpop.eup %2412 }
 0x4af   :  { %v2415_v32 = vpop.eup %2414  ;;  %v2016_v61 = vadd.f32 %v2413_v48, %v2411_v19 }
 0x4b0   :  { %v2417_v22 = vpop.eup %2416 }
 0x4b1   :  { %2426 = vrcp.f32 %v2016_v61  ;;  %v2015_v24 = vadd.f32 %v2417_v22, %v2415_v32 }
 0x4b2   :  { %v2419_v23 = vpop.eup %2418 }
 0x4b3   :  { %v2421_v41 = vpop.eup %2420  ;;  %2428 = vrcp.f32 %v2015_v24 }
 0x4b4   :  { %v2423_v9 = vpop.eup %2422  ;;  %v2018_v52 = vadd.f32 %v2421_v41, %v2419_v23 }
 0x4b5   :  { %v2425_v15 = vpop.eup %2424 }
 0x4b6   :  { %v2017_v18 = vadd.f32 %v2425_v15, %v2423_v9  ;;  %2430 = vrcp.f32 %v2018_v52 }
 0x4b8   :  { %2432 = vrcp.f32 %v2017_v18 }
 0x4be   :  { %v2427_v3 = vpop.eup %2426 }
 0x4bf   :  { %v2028_v60 = vmul.f32 %v2427_v3, %v2411_v19  ;;  %v2064_v1 = vmul.f32 %v2427_v3, %v2413_v48  ;;  %v3897_v19 = vmax.f32 %v3399_v31, 0.0  ;;  %v3902_v31 = vmax.f32 %v3218_v10, 0.0 }
 0x4c0   :  { %v2429_v63 = vpop.eup %2428 }
 0x4c1   :  { %2038 = vperm.xlu0 %2344, %v2028_v60   ;;  %v2027_v25 = vmul.f32 %v2429_v63, %v2415_v32  ;;  %v2063_v16 = vmul.f32 %v2429_v63, %v2417_v22  ;;  %v3898_v32 = vmax.f32 %v3245_v39, 0.0  ;;  %v3899_v22 = vmax.f32 %v3234_v17, 0.0 }
 0x4c2   :  { %v3903_v39 = vmax.f32 %v3257_v6, 0.0  ;;  %v3904_v17 = vmax.f32 %v3320_v13, 0.0  ;;  %v3907_v6 = vmax.f32 %v3292_v12, 0.0 }
 0x4c3   :  { %2033 = vperm.xlu1 %2345, %v2027_v25   ;;  %v2431_v14 = vpop.eup %2430 }
 0x4c4   :  { %v2030_v28 = vmul.f32 %v2431_v14, %v2419_v23  ;;  %v2066_v57 = vmul.f32 %v2431_v14, %v2421_v41  ;;  %v3900_v23 = vmax.f32 %v3289_v8, 0.0  ;;  %v3905_v8 = vmax.f32 %v3305_v55, 0.0 }
 0x4c5   :  { %2074 = vperm.xlu0 %2344, %v2064_v1   ;;  %v2433_v33 = vpop.eup %2432  ;;  %v3906_v14 = vmax.f32 %v3372_v54, 0.0  ;;  %v3909_v55 = vmax.f32 %v3345_v34, 0.0  ;;  %v3910_v54 = vmax.f32 %v3269_v44, 0.0 }
 0x4c6   :  { %v2029_v47 = vmul.f32 %v2433_v33, %v2423_v9  ;;  %v2065_v62 = vmul.f32 %v2433_v33, %v2425_v15 }
 0x4c7   :  { %2069 = vperm.xlu1 %2345, %v2063_v16  }
 0x4c9   :  { %2048 = vperm.xlu0 %2344, %v2030_v28  }
 0x4cb   :  { %2043 = vperm.xlu1 %2345, %v2029_v47  }
 0x4cd   :  { %2084 = vperm.xlu0 %2344, %v2066_v57   ;;  %v3908_v57 = vmax.f32 %v3278_v45, 0.0 }
 0x4cf   :  { %2079 = vperm.xlu1 %2345, %v2065_v62  }
 0x513   :  { %v1629_v59 = vpop.permute.xlu0 %1628  ;;  %v1593_v5 = vpop.permute.xlu1 %1592 }
 0x514   :  { %v1644_v27 = vmul.f32 %v1629_v59, %v3895_v29  ;;  %v1645_v38 = vmul.f32 %v1629_v59, %v3896_v42  ;;  %v1646_v48 = vmul.f32 %v1629_v59, %v3897_v19  ;;  %v1608_v61 = vmul.f32 %v1593_v5, %v3898_v32  ;;  %v3912_v19 = vld [vmem:[#allocation12_spill] sm:$0xff] }
 0x515   :  { %v1609_v24 = vmul.f32 %v1593_v5, %v3899_v22  ;;  %v1610_v41 = vmul.f32 %v1593_v5, %v3900_v23  ;;  %v3911_v42 = vmax.f32 %v3408_v50, 0.0  ;;  %v3924_v50 = vld [vmem:[#allocation13_spill] sm:$0xff] }
 0x516   :  { %v1656_v9 = vadd.f32 %v1644_v27, %v1608_v61  ;;  %v3914_v61 = vld [vmem:[#allocation14_spill] sm:$0xff] }
 0x517   :  { %v1657_v52 = vadd.f32 %v1645_v38, %v1609_v24  ;;  %v1658_v15 = vadd.f32 %v1646_v48, %v1610_v41  ;;  %v1588_v40 = vpop.permute.xlu0 %1587  ;;  %v1624_v18 = vpop.permute.xlu1 %1623  ;;  %v3913_v48 = vmax.f32 %v3912_v19, 0.0  ;;  %v3915_v12 = vmax.f32 %v3914_v61, 0.0  ;;  %v3916_v24 = vld [vmem:[#allocation11_spill] sm:$0xff]  ;;  %v3918_v41 = vld [vmem:[#allocation8_spill] sm:$0xff] }
 0x518   :  { %1668 = vst [vmem:[#allocation5 + $0x18] sm:$0xff] %v1656_v9  ;;  %v1605_v3 = vmul.f32 %v1588_v40, %v3901_v2  ;;  %v1606_v60 = vmul.f32 %v1588_v40, %v3902_v31  ;;  %v1607_v63 = vmul.f32 %v1588_v40, %v3903_v39  ;;  %v1641_v25 = vmul.f32 %v1624_v18, %v3904_v17  ;;  %v3922_v40 = vld [vmem:[#allocation10_spill] sm:$0xff] }
 0x519   :  { %1669 = vst [vmem:[#allocation5 + $0x20] sm:$0xff] %v1657_v52  ;;  %1670 = vst [vmem:[#allocation5 + $0x28] sm:$0xff] %v1658_v15  ;;  %v1642_v1 = vmul.f32 %v1624_v18, %v3905_v8  ;;  %v1643_v16 = vmul.f32 %v1624_v18, %v3906_v14  ;;  %v3917_v45 = vmax.f32 %v3916_v24, 0.0  ;;  %v3919_v34 = vmax.f32 %v3918_v41, 0.0  ;;  %v3920_v52 = vld [vmem:[#allocation9_spill] sm:$0xff] }
 0x51a   :  { %v1653_v33 = vadd.f32 %v1641_v25, %v1605_v3  ;;  %v3921_v44 = vmax.f32 %v3920_v52, 0.0  ;;  %v3923_v18 = vmax.f32 %v3922_v40, 0.0  ;;  %v3925_v3 = vmax.f32 %v3924_v50, 0.0  ;;  %v3945_v50 = vld [vmem:[#allocation15_spill] sm:$0xff] }
 0x51b   :  { %v1654_v7 = vadd.f32 %v1642_v1, %v1606_v60  ;;  %v1655_v28 = vadd.f32 %v1643_v16, %v1607_v63  ;;  %v1603_v47 = vpop.permute.xlu0 %1602  ;;  %v1598_v10 = vpop.permute.xlu1 %1597  ;;  %v3926_v16 = vmax.f32 %v3477_v43, 0.0  ;;  %v3934_v19 = vmax.f32 %v3486_v21, 0.0 }
 0x51c   :  { %1665 = vst [vmem:[#allocation5] sm:$0xff] %v1653_v33  ;;  %v1614_v13 = vmul.f32 %v1603_v47, %v3907_v6  ;;  %v1615_v62 = vmul.f32 %v1603_v47, %v3908_v57  ;;  %v1616_v59 = vmul.f32 %v1603_v47, %v3909_v55  ;;  %v1611_v5 = vmul.f32 %v1598_v10, %v3910_v54 }
 0x51d   :  { %1666 = vst [vmem:[#allocation5 + $0x8] sm:$0xff] %v1654_v7  ;;  %1667 = vst [vmem:[#allocation5 + $0x10] sm:$0xff] %v1655_v28  ;;  %v1612_v9 = vmul.f32 %v1598_v10, %v3919_v34  ;;  %v1613_v15 = vmul.f32 %v1598_v10, %v3921_v44  ;;  %v3927_v7 = vmax.f32 %v3469_v53, 0.0  ;;  %v3928_v10 = vmax.f32 %v3498_v51, 0.0 }
 0x51e   :  { %v3937_v61 = vmax.f32 %v3615_v37, 0.0  ;;  %v3938_v21 = vmax.f32 %v3457_v30, 0.0  ;;  %v3940_v37 = vld [vmem:[#allocation18_spill] sm:$0xff]  ;;  %v3942_v52 = vmax.f32 %v3562_v49, 0.0  ;;  %v3949_v49 = vld [vmem:[#allocation16_spill] sm:$0xff] }
 0x51f   :  { %v1639_v29 = vpop.permute.xlu0 %1638  ;;  %v1634_v27 = vpop.permute.xlu1 %1633  ;;  %v3941_v34 = vmax.f32 %v3940_v37, 0.0 }
 0x520   :  { %v1650_v38 = vmul.f32 %v1639_v29, %v3911_v42  ;;  %v1651_v32 = vmul.f32 %v1639_v29, %v3913_v48  ;;  %v1652_v22 = vmul.f32 %v1639_v29, %v3915_v12  ;;  %v1647_v23 = vmul.f32 %v1634_v27, %v3917_v45 }
 0x521   :  { %v1648_v2 = vmul.f32 %v1634_v27, %v3923_v18  ;;  %v1649_v31 = vmul.f32 %v1634_v27, %v3925_v3  ;;  %v3935_v48 = vmax.f32 %v3515_v4, 0.0  ;;  %v3944_v18 = vmax.f32 %v3608_v11, 0.0  ;;  %v3953_v11 = vld [vmem:[#allocation20_spill] sm:$0xff] }
 0x522   :  { %v1662_v60 = vadd.f32 %v1650_v38, %v1614_v13  ;;  %v1663_v39 = vadd.f32 %v1651_v32, %v1615_v62  ;;  %v1664_v63 = vadd.f32 %v1652_v22, %v1616_v59  ;;  %v1659_v17 = vadd.f32 %v1647_v23, %v1611_v5 }
 0x523   :  { %v1660_v25 = vadd.f32 %v1648_v2, %v1612_v9  ;;  %v1661_v8 = vadd.f32 %v1649_v31, %v1613_v15  ;;  %v3929_v13 = vmax.f32 %v3567_v36, 0.0  ;;  %v3930_v62 = vmax.f32 %v3564_v35, 0.0 }
 0x524   :  { %1674 = vst [vmem:[#allocation5 + $0x48] sm:$0xff] %v1662_v60  ;;  %1675 = vst [vmem:[#allocation5 + $0x50] sm:$0xff] %v1663_v39  ;;  %v3931_v59 = vmax.f32 %v3589_v58, 0.0  ;;  %v3932_v5 = vmax.f32 %v3495_v56, 0.0  ;;  %v3933_v38 = vmax.f32 %v3599_v26, 0.0  ;;  %v3936_v32 = vmax.f32 %v3586_v20, 0.0 }
 0x525   :  { %1676 = vst [vmem:[#allocation5 + $0x58] sm:$0xff] %v1664_v63  ;;  %1671 = vst [vmem:[#allocation5 + $0x30] sm:$0xff] %v1659_v17  ;;  %v3939_v20 = vmax.f32 %v3492_v46, 0.0  ;;  %v3943_v15 = vmax.f32 %v3596_v0, 0.0  ;;  %v3946_v3 = vmax.f32 %v3945_v50, 0.0  ;;  %v3947_v63 = vld [vmem:[#allocation19_spill] sm:$0xff] }
 0x526   :  { %1672 = vst [vmem:[#allocation5 + $0x38] sm:$0xff] %v1660_v25  ;;  %1673 = vst [vmem:[#allocation5 + $0x40] sm:$0xff] %v1661_v8  ;;  %v3948_v17 = vmax.f32 %v3947_v63, 0.0  ;;  %v3950_v8 = vmax.f32 %v3949_v49, 0.0  ;;  %v3951_v0 = vld [vmem:[#allocation17_spill] sm:$0xff] }
 0x53c   :  { %v2039_v1 = vpop.permute.xlu0 %2038 }
 0x53d   :  { %v2054_v33 = vmul.f32 %v2039_v1, %v3926_v16  ;;  %v2055_v28 = vmul.f32 %v2039_v1, %v3927_v7  ;;  %v2056_v6 = vmul.f32 %v2039_v1, %v3928_v10 }
 0x53e   :  { %v2034_v14 = vpop.permute.xlu1 %2033 }
 0x53f   :  { %v2051_v43 = vmul.f32 %v2034_v14, %v3932_v5  ;;  %v2052_v36 = vmul.f32 %v2034_v14, %v3934_v19  ;;  %v2053_v35 = vmul.f32 %v2034_v14, %v3935_v48  ;;  %v3952_v14 = vmax.f32 %v3951_v0, 0.0 }
 0x540   :  { %v2075_v47 = vpop.permute.xlu0 %2074 }
 0x541   :  { %v2090_v57 = vmul.f32 %v2075_v47, %v3929_v13  ;;  %v2091_v55 = vmul.f32 %v2075_v47, %v3930_v62  ;;  %v2092_v54 = vmul.f32 %v2075_v47, %v3931_v59 }
 0x542   :  { %v2070_v29 = vpop.permute.xlu1 %2069 }
 0x543   :  { %v2102_v27 = vadd.f32 %v2090_v57, %v2054_v33  ;;  %v2103_v53 = vadd.f32 %v2091_v55, %v2055_v28  ;;  %v2104_v42 = vadd.f32 %v2092_v54, %v2056_v6  ;;  %v2087_v51 = vmul.f32 %v2070_v29, %v3933_v38  ;;  %v3955_v28 = vld [vmem:[#allocation21_spill] sm:$0xff] }
 0x544   :  { %v2088_v58 = vmul.f32 %v2070_v29, %v3936_v32  ;;  %v2089_v56 = vmul.f32 %v2070_v29, %v3937_v61  ;;  %v2049_v12 = vpop.permute.xlu0 %2048  ;;  %v3954_v33 = vmax.f32 %v3953_v11, 0.0  ;;  %v3956_v47 = vmax.f32 %v3955_v28, 0.0 }
 0x545   :  { %2115 = vst [vmem:[#allocation5 + $0x78] sm:$0xff] %v2102_v27  ;;  %2116 = vst [vmem:[#allocation5 + $0x80] sm:$0xff] %v2103_v53  ;;  %v2099_v22 = vadd.f32 %v2087_v51, %v2051_v43  ;;  %v2060_v4 = vmul.f32 %v2049_v12, %v3938_v21  ;;  %v2061_v23 = vmul.f32 %v2049_v12, %v3939_v20 }
 0x546   :  { %2117 = vst [vmem:[#allocation5 + $0x88] sm:$0xff] %v2104_v42  ;;  %v2100_v24 = vadd.f32 %v2088_v58, %v2052_v36  ;;  %v2101_v26 = vadd.f32 %v2089_v56, %v2053_v35  ;;  %v2044_v45 = vpop.permute.xlu1 %2043  ;;  %v2062_v9 = vmul.f32 %v2049_v12, %v3941_v34 }
 0x547   :  { %2112 = vst [vmem:[#allocation5 + $0x60] sm:$0xff] %v2099_v22  ;;  %v2057_v30 = vmul.f32 %v2044_v45, %v3946_v3  ;;  %v2058_v1 = vmul.f32 %v2044_v45, %v3950_v8  ;;  %v2059_v16 = vmul.f32 %v2044_v45, %v3952_v14 }
 0x548   :  { %2113 = vst [vmem:[#allocation5 + $0x68] sm:$0xff] %v2100_v24  ;;  %2114 = vst [vmem:[#allocation5 + $0x70] sm:$0xff] %v2101_v26  ;;  %v2085_v41 = vpop.permute.xlu0 %2084 }
 0x549   :  { %v2096_v44 = vmul.f32 %v2085_v41, %v3942_v52  ;;  %v2097_v40 = vmul.f32 %v2085_v41, %v3943_v15  ;;  %v2098_v2 = vmul.f32 %v2085_v41, %v3944_v18 }
 0x54a   :  { %v2080_v31 = vpop.permute.xlu1 %2079 }
 0x54b   :  { %v2108_v46 = vadd.f32 %v2096_v44, %v2060_v4  ;;  %v2109_v60 = vadd.f32 %v2097_v40, %v2061_v23  ;;  %v2110_v39 = vadd.f32 %v2098_v2, %v2062_v9  ;;  %v2093_v25 = vmul.f32 %v2080_v31, %v3948_v17 }
 0x54c   :  { %v2094_v7 = vmul.f32 %v2080_v31, %v3954_v33  ;;  %v2095_v10 = vmul.f32 %v2080_v31, %v3956_v47 }
 0x54d   :  { %2121 = vst [vmem:[#allocation5 + $0xa8] sm:$0xff] %v2108_v46  ;;  %2122 = vst [vmem:[#allocation5 + $0xb0] sm:$0xff] %v2109_v60  ;;  %v2105_v6 = vadd.f32 %v2093_v25, %v2057_v30 }
 0x54e   :  { %2123 = vst [vmem:[#allocation5 + $0xb8] sm:$0xff] %v2110_v39  ;;  %v2106_v13 = vadd.f32 %v2094_v7, %v2058_v1  ;;  %v2107_v57 = vadd.f32 %v2095_v10, %v2059_v16 }
 0x54f   :  { %2118 = vst [vmem:[#allocation5 + $0x90] sm:$0xff] %v2105_v6 }
 0x550   :  { %2119 = vst [vmem:[#allocation5 + $0x98] sm:$0xff] %v2106_v13  ;;  %2120 = vst [vmem:[#allocation5 + $0xa0] sm:$0xff] %v2107_v57 }
 0x551   :  { %2465 = shalt.err (!%p2462_p9)
}
 0x552   :  { %s2491_s20 = smov 384   ;;  %s2492_s21 = smov 24  }
 0x553   :  { %2135 = dma.vmem_to_hbm [thread:$0]  %s2130_s18, 3072, %s3818_s7, [#allocation4], %s2491_s20, %s2491_s20, %s2492_s21  }
 0x554   :  { %2476 = dma.done.wait [#allocation4], 3072  }
 0x555   :  { %2477 = vsyncadd [#allocation4], 4294964224 }
 0x556   :  { %2139 = vsyncpa [#allocation3], 1 }
 0x557   :  { %2140 = vsyncpa [#allocation4], 1 }

</bundles_post_ra>
